<compile_context>
chip_gen: v6e
topology: v6e:2x2x1
jax: 0.10.0
libtpu: 0.0.40
codegen_flags: <defaults>
</compile_context>

<pallas_src>
import random

import jax
import jax.numpy as jnp
from jax import lax
from jax.experimental import pallas as pl
from jax.experimental.pallas import tpu as pltpu

# ---------------- problem sizes (small, consistent with the module) ----------------
B = 2        # batch
S = 10       # src_len
T = 8        # trg_len
H = 32       # hid_dim (encoder.hid_dim == decoder.hid_dim), n_layers = 1


# --------------------------------- Pallas kernel -----------------------------------
def seq2seq_kernel(tf_ref, src_ref, trg_ref,
                   e_wih_ref, e_whh_ref, e_b_ref,
                   d_wih_ref, d_whh_ref, d_b_ref,
                   wf_ref, bf_ref, fc_wt_ref, fc_b_ref,
                   out_ref):
    Bk, Sk = src_ref.shape
    Tk = out_ref.shape[1]
    Hk = e_whh_ref.shape[0]
    G = 4 * Hk

    src = src_ref[...]
    trg = trg_ref[...]
    e_wih = e_wih_ref[...]      # (1, 4H)
    e_whh = e_whh_ref[...]      # (H, 4H)
    e_b = e_b_ref[...]          # (1, 4H)
    d_wih = d_wih_ref[...]      # (1, 4H)
    d_whh = d_whh_ref[...]      # (H, 4H)
    d_b = d_b_ref[...]          # (1, 4H)
    w_fused = wf_ref[...]       # (H, 4H) = d_whh + fc_w @ d_wih
    b_fused = bf_ref[...]       # (1, 4H) = d_b  + fc_b @ d_wih
    fc_wt = fc_wt_ref[...]      # (1, H)  = fc_w.T
    fc_b = fc_b_ref[...]        # (1, 1)

    def cell_update(gates, c):
        # Full 128-lane sigmoid/tanh (one vreg each): 2 EUP pushes, not 4 masked ones.
        sg = jax.nn.sigmoid(gates)
        tg = jnp.tanh(gates)
        i = sg[:, 0 * Hk:1 * Hk]
        f = sg[:, 1 * Hk:2 * Hk]
        g = tg[:, 2 * Hk:3 * Hk]
        o = sg[:, 3 * Hk:4 * Hk]
        c_new = f * c + i * g
        h_new = o * jnp.tanh(c_new)
        return h_new, c_new

    # ---------------- encoder: fully unrolled, input term = VPU broadcast -----------
    zeros_h = jnp.zeros((Bk, Hk), jnp.float32)
    # t = 0: h0 = c0 = 0, so the recurrent matmul vanishes.
    h, c = cell_update(src[:, 0:1] * e_wih + e_b, zeros_h)
    for t in range(1, Sk):                                   # static -> unrolled
        xw_t = src[:, t:t + 1] * e_wih + e_b                 # (B,1)*(1,4H) broadcast, off critical path
        gates = jnp.dot(h, e_whh, preferred_element_type=jnp.float32) + xw_t
        h, c = cell_update(gates, c)

    # ---------------- decoder: one MXU matmul per step (fc head fused) --------------
    xw_first = src[:, Sk - 1:Sk] * d_wih + d_b               # input0 = src[:, -1, -1:]
    b_fused_b = jnp.broadcast_to(b_fused, (Bk, G))           # hoisted broadcast
    col = lax.broadcasted_iota(jnp.int32, (Bk, Tk), 1)
    out_acc = jnp.zeros((Bk, Tk), jnp.float32)

    for t in range(Tk):                                      # static -> unrolled
        if t == 0:
            w_t, bx_t = d_whh, xw_first
        else:
            # teacher-forcing decision of the PREVIOUS step selects this step's input
            tf = tf_ref[t - 1] > 0
            xw_t = trg[:, t - 1:t] * d_wih + d_b             # teacher-forced contribution
            w_t = jnp.where(tf, d_whh, w_fused)              # weight select (VPU, off critical path)
            bx_t = jnp.where(tf, xw_t, b_fused_b)
        gates = jnp.dot(h, w_t, preferred_element_type=jnp.float32) + bx_t
        h, c = cell_update(gates, c)
        # fc head kept off the MXU: VPU multiply + lane reduction; pred only feeds output.
        pred = jnp.sum(h * fc_wt, axis=1, keepdims=True) + fc_b    # (B, 1)
        out_acc = jnp.where(col == t, pred, out_acc)

    out_ref[...] = out_acc                                   # single lane-dense store


def seq2seq_forward(src, trg, params, tf_flags):
    (e_wih, e_whh, e_b, d_wih, d_whh, d_b, fc_w, fc_b) = params
    # One-time weight folds (parameter preprocessing, reused by every decoder step).
    w_fused = d_whh + fc_w @ d_wih           # (H, 4H)
    b_fused = d_b + fc_b @ d_wih             # (1, 4H)
    fc_wt = fc_w.T                           # (1, H)

    vmem = pl.BlockSpec(memory_space=pltpu.MemorySpace.VMEM)
    smem = pl.BlockSpec(memory_space=pltpu.MemorySpace.SMEM)
    return pl.pallas_call(
        seq2seq_kernel,
        out_shape=jax.ShapeDtypeStruct((src.shape[0], trg.shape[1]), jnp.float32),
        in_specs=[smem] + [vmem] * 12,
        out_specs=vmem,
    )(tf_flags, src, trg,
      e_wih, e_whh, e_b,
      d_wih, d_whh, d_b,
      w_fused, b_fused, fc_wt, fc_b)


# ------------------------------ pure-JAX reference ---------------------------------
def seq2seq_reference(src, trg, params, tf_flags):
    (e_wih, e_whh, e_b, d_wih, d_whh, d_b, fc_w, fc_b) = params

    def lstm_step(x, h, c, wih, whh, b):
        gates = x @ wih + h @ whh + b
        i = jax.nn.sigmoid(gates[:, 0 * H:1 * H])
        f = jax.nn.sigmoid(gates[:, 1 * H:2 * H])
        g = jnp.tanh(gates[:, 2 * H:3 * H])
        o = jax.nn.sigmoid(gates[:, 3 * H:4 * H])
        c_new = f * c + i * g
        return o * jnp.tanh(c_new), c_new

    h = jnp.zeros((B, H), jnp.float32)
    c = jnp.zeros((B, H), jnp.float32)
    for t in range(S):
        h, c = lstm_step(src[:, t:t + 1], h, c, e_wih, e_whh, e_b)

    inp = src[:, S - 1:S]
    outs = []
    for t in range(T):
        h, c = lstm_step(inp, h, c, d_wih, d_whh, d_b)
        pred = h @ fc_w + fc_b
        outs.append(pred)
        inp = trg[:, t:t + 1] if int(tf_flags[t]) > 0 else pred
    return jnp.concatenate(outs, axis=1)


# --------------------------------------- main --------------------------------------
if __name__ == "__main__":
    key = jax.random.PRNGKey(0)
    ks = jax.random.split(key, 12)
    scale = 1.0 / jnp.sqrt(jnp.float32(H))

    def uni(k, shape):
        return jax.random.uniform(k, shape, jnp.float32, -scale, scale)

    # encoder LSTM (input_dim=1, hid_dim=H, n_layers=1); biases b_ih + b_hh combined
    e_wih = uni(ks[0], (1, 4 * H))
    e_whh = uni(ks[1], (H, 4 * H))
    e_b = uni(ks[2], (1, 4 * H)) + uni(ks[3], (1, 4 * H))
    # decoder LSTM (input_dim=1, hid_dim=H, n_layers=1)
    d_wih = uni(ks[4], (1, 4 * H))
    d_whh = uni(ks[5], (H, 4 * H))
    d_b = uni(ks[6], (1, 4 * H)) + uni(ks[7], (1, 4 * H))
    # fc_out: Linear(hid_dim -> output_dim=1)
    fc_w = uni(ks[8], (H, 1))
    fc_b = uni(ks[9], (1, 1))
    params = (e_wih, e_whh, e_b, d_wih, d_whh, d_b, fc_w, fc_b)

    # inputs: src (B, S), trg (B, T)  -- feature dim of 1 folded away
    src = jax.random.normal(ks[10], (B, S), jnp.float32)
    trg = jax.random.normal(ks[11], (B, T), jnp.float32)

    # teacher-forcing decisions (random.random() < 0.5), seeded -> deterministic
    random.seed(0)
    tf_flags = jnp.array([1 if random.random() < 0.5 else 0 for _ in range(T)],
                         dtype=jnp.int32)

    out = seq2seq_forward(src, trg, params, tf_flags)
    out = jax.block_until_ready(out)

    ref = seq2seq_reference(src, trg, params, tf_flags)
    assert out.shape == (B, T), out.shape
    # slightly relaxed vs 1e-5: the fc/feedback fusion reorders f32 arithmetic
    assert jnp.allclose(out, ref, atol=1e-4, rtol=1e-4), (out, ref)

    print("KERNEL_OK")
</pallas_src>

<mosaic_0001>
module attributes {stable_mosaic.version = 11 : i64} {
  func.func @seq2seq_kernel(%arg0: memref<8xi32, #tpu.memory_space<smem>>, %arg1: memref<2x10xf32, #tpu.memory_space<vmem>>, %arg2: memref<2x8xf32, #tpu.memory_space<vmem>>, %arg3: memref<1x128xf32, #tpu.memory_space<vmem>>, %arg4: memref<32x128xf32, #tpu.memory_space<vmem>>, %arg5: memref<1x128xf32, #tpu.memory_space<vmem>>, %arg6: memref<1x128xf32, #tpu.memory_space<vmem>>, %arg7: memref<32x128xf32, #tpu.memory_space<vmem>>, %arg8: memref<1x128xf32, #tpu.memory_space<vmem>>, %arg9: memref<32x128xf32, #tpu.memory_space<vmem>>, %arg10: memref<1x128xf32, #tpu.memory_space<vmem>>, %arg11: memref<1x32xf32, #tpu.memory_space<vmem>>, %arg12: memref<1x1xf32, #tpu.memory_space<vmem>>, %arg13: memref<2x8xf32, #tpu.memory_space<vmem>>) attributes {dimension_semantics = [], scalar_prefetch = 0 : i64, scratch_operands = 0 : i64, tpu.core_type = #tpu.core_type<tc>} {
    %c0 = arith.constant 0 : index
    %c0_0 = arith.constant 0 : index
    %0 = vector.load %arg1[%c0, %c0_0] : memref<2x10xf32, #tpu.memory_space<vmem>>, vector<2x10xf32>
    %c0_1 = arith.constant 0 : index
    %c0_2 = arith.constant 0 : index
    %1 = vector.load %arg2[%c0_1, %c0_2] : memref<2x8xf32, #tpu.memory_space<vmem>>, vector<2x8xf32>
    %c0_3 = arith.constant 0 : index
    %c0_4 = arith.constant 0 : index
    %2 = vector.load %arg3[%c0_3, %c0_4] : memref<1x128xf32, #tpu.memory_space<vmem>>, vector<1x128xf32>
    %c0_5 = arith.constant 0 : index
    %c0_6 = arith.constant 0 : index
    %3 = vector.load %arg4[%c0_5, %c0_6] : memref<32x128xf32, #tpu.memory_space<vmem>>, vector<32x128xf32>
    %c0_7 = arith.constant 0 : index
    %c0_8 = arith.constant 0 : index
    %4 = vector.load %arg5[%c0_7, %c0_8] : memref<1x128xf32, #tpu.memory_space<vmem>>, vector<1x128xf32>
    %c0_9 = arith.constant 0 : index
    %c0_10 = arith.constant 0 : index
    %5 = vector.load %arg6[%c0_9, %c0_10] : memref<1x128xf32, #tpu.memory_space<vmem>>, vector<1x128xf32>
    %c0_11 = arith.constant 0 : index
    %c0_12 = arith.constant 0 : index
    %6 = vector.load %arg7[%c0_11, %c0_12] : memref<32x128xf32, #tpu.memory_space<vmem>>, vector<32x128xf32>
    %c0_13 = arith.constant 0 : index
    %c0_14 = arith.constant 0 : index
    %7 = vector.load %arg8[%c0_13, %c0_14] : memref<1x128xf32, #tpu.memory_space<vmem>>, vector<1x128xf32>
    %c0_15 = arith.constant 0 : index
    %c0_16 = arith.constant 0 : index
    %8 = vector.load %arg9[%c0_15, %c0_16] : memref<32x128xf32, #tpu.memory_space<vmem>>, vector<32x128xf32>
    %c0_17 = arith.constant 0 : index
    %c0_18 = arith.constant 0 : index
    %9 = vector.load %arg10[%c0_17, %c0_18] : memref<1x128xf32, #tpu.memory_space<vmem>>, vector<1x128xf32>
    %c0_19 = arith.constant 0 : index
    %c0_20 = arith.constant 0 : index
    %10 = vector.load %arg11[%c0_19, %c0_20] : memref<1x32xf32, #tpu.memory_space<vmem>>, vector<1x32xf32>
    %c0_21 = arith.constant 0 : index
    %c0_22 = arith.constant 0 : index
    %11 = vector.load %arg12[%c0_21, %c0_22] : memref<1x1xf32, #tpu.memory_space<vmem>>, vector<1x1xf32>
    %cst = arith.constant 0.000000e+00 : f32
    %12 = vector.broadcast %cst : f32 to vector<2x32xf32>
    %13 = vector.extract_strided_slice %0 {offsets = [0, 0], sizes = [2, 1], strides = [1, 1]} : vector<2x10xf32> to vector<2x1xf32>
    %14 = vector.broadcast %13 : vector<2x1xf32> to vector<2x128xf32>
    %15 = vector.broadcast %2 : vector<1x128xf32> to vector<2x128xf32>
    %16 = arith.mulf %14, %15 : vector<2x128xf32>
    %17 = vector.broadcast %4 : vector<1x128xf32> to vector<2x128xf32>
    %18 = arith.addf %16, %17 : vector<2x128xf32>
    %19 = arith.negf %18 : vector<2x128xf32>
    %20 = math.exp %19 : vector<2x128xf32>
    %cst_23 = arith.constant 1.000000e+00 : f32
    %21 = vector.broadcast %cst_23 : f32 to vector<2x128xf32>
    %22 = arith.addf %21, %20 : vector<2x128xf32>
    %23 = arith.divf %21, %22 : vector<2x128xf32>
    %24 = math.tanh %18 : vector<2x128xf32>
    %25 = vector.extract_strided_slice %23 {offsets = [0, 0], sizes = [2, 32], strides = [1, 1]} : vector<2x128xf32> to vector<2x32xf32>
    %26 = vector.extract_strided_slice %23 {offsets = [0, 32], sizes = [2, 32], strides = [1, 1]} : vector<2x128xf32> to vector<2x32xf32>
    %27 = vector.extract_strided_slice %24 {offsets = [0, 64], sizes = [2, 32], strides = [1, 1]} : vector<2x128xf32> to vector<2x32xf32>
    %28 = vector.extract_strided_slice %23 {offsets = [0, 96], sizes = [2, 32], strides = [1, 1]} : vector<2x128xf32> to vector<2x32xf32>
    %29 = arith.mulf %26, %12 : vector<2x32xf32>
    %30 = arith.mulf %25, %27 : vector<2x32xf32>
    %31 = arith.addf %29, %30 : vector<2x32xf32>
    %32 = math.tanh %31 : vector<2x32xf32>
    %33 = arith.mulf %28, %32 : vector<2x32xf32>
    %34 = vector.extract_strided_slice %0 {offsets = [0, 1], sizes = [2, 1], strides = [1, 1]} : vector<2x10xf32> to vector<2x1xf32>
    %35 = vector.broadcast %34 : vector<2x1xf32> to vector<2x128xf32>
    %36 = vector.broadcast %2 : vector<1x128xf32> to vector<2x128xf32>
    %37 = arith.mulf %35, %36 : vector<2x128xf32>
    %38 = vector.broadcast %4 : vector<1x128xf32> to vector<2x128xf32>
    %39 = arith.addf %37, %38 : vector<2x128xf32>
    %cst_24 = arith.constant dense<0.000000e+00> : vector<2x128xf32>
    %40 = tpu.matmul %33, %3, %cst_24 {dimension_numbers = #tpu.dot_dimension_numbers<[1], [0], [0], [1], [0, 0, 1, 1], [], []>} : vector<2x32xf32>, vector<32x128xf32>, vector<2x128xf32> -> vector<2x128xf32>
    %41 = arith.addf %40, %39 : vector<2x128xf32>
    %42 = arith.negf %41 : vector<2x128xf32>
    %43 = math.exp %42 : vector<2x128xf32>
    %cst_25 = arith.constant 1.000000e+00 : f32
    %44 = vector.broadcast %cst_25 : f32 to vector<2x128xf32>
    %45 = arith.addf %44, %43 : vector<2x128xf32>
    %46 = arith.divf %44, %45 : vector<2x128xf32>
    %47 = math.tanh %41 : vector<2x128xf32>
    %48 = vector.extract_strided_slice %46 {offsets = [0, 0], sizes = [2, 32], strides = [1, 1]} : vector<2x128xf32> to vector<2x32xf32>
    %49 = vector.extract_strided_slice %46 {offsets = [0, 32], sizes = [2, 32], strides = [1, 1]} : vector<2x128xf32> to vector<2x32xf32>
    %50 = vector.extract_strided_slice %47 {offsets = [0, 64], sizes = [2, 32], strides = [1, 1]} : vector<2x128xf32> to vector<2x32xf32>
    %51 = vector.extract_strided_slice %46 {offsets = [0, 96], sizes = [2, 32], strides = [1, 1]} : vector<2x128xf32> to vector<2x32xf32>
    %52 = arith.mulf %49, %31 : vector<2x32xf32>
    %53 = arith.mulf %48, %50 : vector<2x32xf32>
    %54 = arith.addf %52, %53 : vector<2x32xf32>
    %55 = math.tanh %54 : vector<2x32xf32>
    %56 = arith.mulf %51, %55 : vector<2x32xf32>
    %57 = vector.extract_strided_slice %0 {offsets = [0, 2], sizes = [2, 1], strides = [1, 1]} : vector<2x10xf32> to vector<2x1xf32>
    %58 = vector.broadcast %57 : vector<2x1xf32> to vector<2x128xf32>
    %59 = vector.broadcast %2 : vector<1x128xf32> to vector<2x128xf32>
    %60 = arith.mulf %58, %59 : vector<2x128xf32>
    %61 = vector.broadcast %4 : vector<1x128xf32> to vector<2x128xf32>
    %62 = arith.addf %60, %61 : vector<2x128xf32>
    %cst_26 = arith.constant dense<0.000000e+00> : vector<2x128xf32>
    %63 = tpu.matmul %56, %3, %cst_26 {dimension_numbers = #tpu.dot_dimension_numbers<[1], [0], [0], [1], [0, 0, 1, 1], [], []>} : vector<2x32xf32>, vector<32x128xf32>, vector<2x128xf32> -> vector<2x128xf32>
    %64 = arith.addf %63, %62 : vector<2x128xf32>
    %65 = arith.negf %64 : vector<2x128xf32>
    %66 = math.exp %65 : vector<2x128xf32>
    %cst_27 = arith.constant 1.000000e+00 : f32
    %67 = vector.broadcast %cst_27 : f32 to vector<2x128xf32>
    %68 = arith.addf %67, %66 : vector<2x128xf32>
    %69 = arith.divf %67, %68 : vector<2x128xf32>
    %70 = math.tanh %64 : vector<2x128xf32>
    %71 = vector.extract_strided_slice %69 {offsets = [0, 0], sizes = [2, 32], strides = [1, 1]} : vector<2x128xf32> to vector<2x32xf32>
    %72 = vector.extract_strided_slice %69 {offsets = [0, 32], sizes = [2, 32], strides = [1, 1]} : vector<2x128xf32> to vector<2x32xf32>
    %73 = vector.extract_strided_slice %70 {offsets = [0, 64], sizes = [2, 32], strides = [1, 1]} : vector<2x128xf32> to vector<2x32xf32>
    %74 = vector.extract_strided_slice %69 {offsets = [0, 96], sizes = [2, 32], strides = [1, 1]} : vector<2x128xf32> to vector<2x32xf32>
    %75 = arith.mulf %72, %54 : vector<2x32xf32>
    %76 = arith.mulf %71, %73 : vector<2x32xf32>
    %77 = arith.addf %75, %76 : vector<2x32xf32>
    %78 = math.tanh %77 : vector<2x32xf32>
    %79 = arith.mulf %74, %78 : vector<2x32xf32>
    %80 = vector.extract_strided_slice %0 {offsets = [0, 3], sizes = [2, 1], strides = [1, 1]} : vector<2x10xf32> to vector<2x1xf32>
    %81 = vector.broadcast %80 : vector<2x1xf32> to vector<2x128xf32>
    %82 = vector.broadcast %2 : vector<1x128xf32> to vector<2x128xf32>
    %83 = arith.mulf %81, %82 : vector<2x128xf32>
    %84 = vector.broadcast %4 : vector<1x128xf32> to vector<2x128xf32>
    %85 = arith.addf %83, %84 : vector<2x128xf32>
    %cst_28 = arith.constant dense<0.000000e+00> : vector<2x128xf32>
    %86 = tpu.matmul %79, %3, %cst_28 {dimension_numbers = #tpu.dot_dimension_numbers<[1], [0], [0], [1], [0, 0, 1, 1], [], []>} : vector<2x32xf32>, vector<32x128xf32>, vector<2x128xf32> -> vector<2x128xf32>
    %87 = arith.addf %86, %85 : vector<2x128xf32>
    %88 = arith.negf %87 : vector<2x128xf32>
    %89 = math.exp %88 : vector<2x128xf32>
    %cst_29 = arith.constant 1.000000e+00 : f32
    %90 = vector.broadcast %cst_29 : f32 to vector<2x128xf32>
    %91 = arith.addf %90, %89 : vector<2x128xf32>
    %92 = arith.divf %90, %91 : vector<2x128xf32>
    %93 = math.tanh %87 : vector<2x128xf32>
    %94 = vector.extract_strided_slice %92 {offsets = [0, 0], sizes = [2, 32], strides = [1, 1]} : vector<2x128xf32> to vector<2x32xf32>
    %95 = vector.extract_strided_slice %92 {offsets = [0, 32], sizes = [2, 32], strides = [1, 1]} : vector<2x128xf32> to vector<2x32xf32>
    %96 = vector.extract_strided_slice %93 {offsets = [0, 64], sizes = [2, 32], strides = [1, 1]} : vector<2x128xf32> to vector<2x32xf32>
    %97 = vector.extract_strided_slice %92 {offsets = [0, 96], sizes = [2, 32], strides = [1, 1]} : vector<2x128xf32> to vector<2x32xf32>
    %98 = arith.mulf %95, %77 : vector<2x32xf32>
    %99 = arith.mulf %94, %96 : vector<2x32xf32>
    %100 = arith.addf %98, %99 : vector<2x32xf32>
    %101 = math.tanh %100 : vector<2x32xf32>
    %102 = arith.mulf %97, %101 : vector<2x32xf32>
    %103 = vector.extract_strided_slice %0 {offsets = [0, 4], sizes = [2, 1], strides = [1, 1]} : vector<2x10xf32> to vector<2x1xf32>
    %104 = vector.broadcast %103 : vector<2x1xf32> to vector<2x128xf32>
    %105 = vector.broadcast %2 : vector<1x128xf32> to vector<2x128xf32>
    %106 = arith.mulf %104, %105 : vector<2x128xf32>
    %107 = vector.broadcast %4 : vector<1x128xf32> to vector<2x128xf32>
    %108 = arith.addf %106, %107 : vector<2x128xf32>
    %cst_30 = arith.constant dense<0.000000e+00> : vector<2x128xf32>
    %109 = tpu.matmul %102, %3, %cst_30 {dimension_numbers = #tpu.dot_dimension_numbers<[1], [0], [0], [1], [0, 0, 1, 1], [], []>} : vector<2x32xf32>, vector<32x128xf32>, vector<2x128xf32> -> vector<2x128xf32>
    %110 = arith.addf %109, %108 : vector<2x128xf32>
    %111 = arith.negf %110 : vector<2x128xf32>
    %112 = math.exp %111 : vector<2x128xf32>
    %cst_31 = arith.constant 1.000000e+00 : f32
    %113 = vector.broadcast %cst_31 : f32 to vector<2x128xf32>
    %114 = arith.addf %113, %112 : vector<2x128xf32>
    %115 = arith.divf %113, %114 : vector<2x128xf32>
    %116 = math.tanh %110 : vector<2x128xf32>
    %117 = vector.extract_strided_slice %115 {offsets = [0, 0], sizes = [2, 32], strides = [1, 1]} : vector<2x128xf32> to vector<2x32xf32>
    %118 = vector.extract_strided_slice %115 {offsets = [0, 32], sizes = [2, 32], strides = [1, 1]} : vector<2x128xf32> to vector<2x32xf32>
    %119 = vector.extract_strided_slice %116 {offsets = [0, 64], sizes = [2, 32], strides = [1, 1]} : vector<2x128xf32> to vector<2x32xf32>
    %120 = vector.extract_strided_slice %115 {offsets = [0, 96], sizes = [2, 32], strides = [1, 1]} : vector<2x128xf32> to vector<2x32xf32>
    %121 = arith.mulf %118, %100 : vector<2x32xf32>
    %122 = arith.mulf %117, %119 : vector<2x32xf32>
    %123 = arith.addf %121, %122 : vector<2x32xf32>
    %124 = math.tanh %123 : vector<2x32xf32>
    %125 = arith.mulf %120, %124 : vector<2x32xf32>
    %126 = vector.extract_strided_slice %0 {offsets = [0, 5], sizes = [2, 1], strides = [1, 1]} : vector<2x10xf32> to vector<2x1xf32>
    %127 = vector.broadcast %126 : vector<2x1xf32> to vector<2x128xf32>
    %128 = vector.broadcast %2 : vector<1x128xf32> to vector<2x128xf32>
    %129 = arith.mulf %127, %128 : vector<2x128xf32>
    %130 = vector.broadcast %4 : vector<1x128xf32> to vector<2x128xf32>
    %131 = arith.addf %129, %130 : vector<2x128xf32>
    %cst_32 = arith.constant dense<0.000000e+00> : vector<2x128xf32>
    %132 = tpu.matmul %125, %3, %cst_32 {dimension_numbers = #tpu.dot_dimension_numbers<[1], [0], [0], [1], [0, 0, 1, 1], [], []>} : vector<2x32xf32>, vector<32x128xf32>, vector<2x128xf32> -> vector<2x128xf32>
    %133 = arith.addf %132, %131 : vector<2x128xf32>
    %134 = arith.negf %133 : vector<2x128xf32>
    %135 = math.exp %134 : vector<2x128xf32>
    %cst_33 = arith.constant 1.000000e+00 : f32
    %136 = vector.broadcast %cst_33 : f32 to vector<2x128xf32>
    %137 = arith.addf %136, %135 : vector<2x128xf32>
    %138 = arith.divf %136, %137 : vector<2x128xf32>
    %139 = math.tanh %133 : vector<2x128xf32>
    %140 = vector.extract_strided_slice %138 {offsets = [0, 0], sizes = [2, 32], strides = [1, 1]} : vector<2x128xf32> to vector<2x32xf32>
    %141 = vector.extract_strided_slice %138 {offsets = [0, 32], sizes = [2, 32], strides = [1, 1]} : vector<2x128xf32> to vector<2x32xf32>
    %142 = vector.extract_strided_slice %139 {offsets = [0, 64], sizes = [2, 32], strides = [1, 1]} : vector<2x128xf32> to vector<2x32xf32>
    %143 = vector.extract_strided_slice %138 {offsets = [0, 96], sizes = [2, 32], strides = [1, 1]} : vector<2x128xf32> to vector<2x32xf32>
    %144 = arith.mulf %141, %123 : vector<2x32xf32>
    %145 = arith.mulf %140, %142 : vector<2x32xf32>
    %146 = arith.addf %144, %145 : vector<2x32xf32>
    %147 = math.tanh %146 : vector<2x32xf32>
    %148 = arith.mulf %143, %147 : vector<2x32xf32>
    %149 = vector.extract_strided_slice %0 {offsets = [0, 6], sizes = [2, 1], strides = [1, 1]} : vector<2x10xf32> to vector<2x1xf32>
    %150 = vector.broadcast %149 : vector<2x1xf32> to vector<2x128xf32>
    %151 = vector.broadcast %2 : vector<1x128xf32> to vector<2x128xf32>
    %152 = arith.mulf %150, %151 : vector<2x128xf32>
    %153 = vector.broadcast %4 : vector<1x128xf32> to vector<2x128xf32>
    %154 = arith.addf %152, %153 : vector<2x128xf32>
    %cst_34 = arith.constant dense<0.000000e+00> : vector<2x128xf32>
    %155 = tpu.matmul %148, %3, %cst_34 {dimension_numbers = #tpu.dot_dimension_numbers<[1], [0], [0], [1], [0, 0, 1, 1], [], []>} : vector<2x32xf32>, vector<32x128xf32>, vector<2x128xf32> -> vector<2x128xf32>
    %156 = arith.addf %155, %154 : vector<2x128xf32>
    %157 = arith.negf %156 : vector<2x128xf32>
    %158 = math.exp %157 : vector<2x128xf32>
    %cst_35 = arith.constant 1.000000e+00 : f32
    %159 = vector.broadcast %cst_35 : f32 to vector<2x128xf32>
    %160 = arith.addf %159, %158 : vector<2x128xf32>
    %161 = arith.divf %159, %160 : vector<2x128xf32>
    %162 = math.tanh %156 : vector<2x128xf32>
    %163 = vector.extract_strided_slice %161 {offsets = [0, 0], sizes = [2, 32], strides = [1, 1]} : vector<2x128xf32> to vector<2x32xf32>
    %164 = vector.extract_strided_slice %161 {offsets = [0, 32], sizes = [2, 32], strides = [1, 1]} : vector<2x128xf32> to vector<2x32xf32>
    %165 = vector.extract_strided_slice %162 {offsets = [0, 64], sizes = [2, 32], strides = [1, 1]} : vector<2x128xf32> to vector<2x32xf32>
    %166 = vector.extract_strided_slice %161 {offsets = [0, 96], sizes = [2, 32], strides = [1, 1]} : vector<2x128xf32> to vector<2x32xf32>
    %167 = arith.mulf %164, %146 : vector<2x32xf32>
    %168 = arith.mulf %163, %165 : vector<2x32xf32>
    %169 = arith.addf %167, %168 : vector<2x32xf32>
    %170 = math.tanh %169 : vector<2x32xf32>
    %171 = arith.mulf %166, %170 : vector<2x32xf32>
    %172 = vector.extract_strided_slice %0 {offsets = [0, 7], sizes = [2, 1], strides = [1, 1]} : vector<2x10xf32> to vector<2x1xf32>
    %173 = vector.broadcast %172 : vector<2x1xf32> to vector<2x128xf32>
    %174 = vector.broadcast %2 : vector<1x128xf32> to vector<2x128xf32>
    %175 = arith.mulf %173, %174 : vector<2x128xf32>
    %176 = vector.broadcast %4 : vector<1x128xf32> to vector<2x128xf32>
    %177 = arith.addf %175, %176 : vector<2x128xf32>
    %cst_36 = arith.constant dense<0.000000e+00> : vector<2x128xf32>
    %178 = tpu.matmul %171, %3, %cst_36 {dimension_numbers = #tpu.dot_dimension_numbers<[1], [0], [0], [1], [0, 0, 1, 1], [], []>} : vector<2x32xf32>, vector<32x128xf32>, vector<2x128xf32> -> vector<2x128xf32>
    %179 = arith.addf %178, %177 : vector<2x128xf32>
    %180 = arith.negf %179 : vector<2x128xf32>
    %181 = math.exp %180 : vector<2x128xf32>
    %cst_37 = arith.constant 1.000000e+00 : f32
    %182 = vector.broadcast %cst_37 : f32 to vector<2x128xf32>
    %183 = arith.addf %182, %181 : vector<2x128xf32>
    %184 = arith.divf %182, %183 : vector<2x128xf32>
    %185 = math.tanh %179 : vector<2x128xf32>
    %186 = vector.extract_strided_slice %184 {offsets = [0, 0], sizes = [2, 32], strides = [1, 1]} : vector<2x128xf32> to vector<2x32xf32>
    %187 = vector.extract_strided_slice %184 {offsets = [0, 32], sizes = [2, 32], strides = [1, 1]} : vector<2x128xf32> to vector<2x32xf32>
    %188 = vector.extract_strided_slice %185 {offsets = [0, 64], sizes = [2, 32], strides = [1, 1]} : vector<2x128xf32> to vector<2x32xf32>
    %189 = vector.extract_strided_slice %184 {offsets = [0, 96], sizes = [2, 32], strides = [1, 1]} : vector<2x128xf32> to vector<2x32xf32>
    %190 = arith.mulf %187, %169 : vector<2x32xf32>
    %191 = arith.mulf %186, %188 : vector<2x32xf32>
    %192 = arith.addf %190, %191 : vector<2x32xf32>
    %193 = math.tanh %192 : vector<2x32xf32>
    %194 = arith.mulf %189, %193 : vector<2x32xf32>
    %195 = vector.extract_strided_slice %0 {offsets = [0, 8], sizes = [2, 1], strides = [1, 1]} : vector<2x10xf32> to vector<2x1xf32>
    %196 = vector.broadcast %195 : vector<2x1xf32> to vector<2x128xf32>
    %197 = vector.broadcast %2 : vector<1x128xf32> to vector<2x128xf32>
    %198 = arith.mulf %196, %197 : vector<2x128xf32>
    %199 = vector.broadcast %4 : vector<1x128xf32> to vector<2x128xf32>
    %200 = arith.addf %198, %199 : vector<2x128xf32>
    %cst_38 = arith.constant dense<0.000000e+00> : vector<2x128xf32>
    %201 = tpu.matmul %194, %3, %cst_38 {dimension_numbers = #tpu.dot_dimension_numbers<[1], [0], [0], [1], [0, 0, 1, 1], [], []>} : vector<2x32xf32>, vector<32x128xf32>, vector<2x128xf32> -> vector<2x128xf32>
    %202 = arith.addf %201, %200 : vector<2x128xf32>
    %203 = arith.negf %202 : vector<2x128xf32>
    %204 = math.exp %203 : vector<2x128xf32>
    %cst_39 = arith.constant 1.000000e+00 : f32
    %205 = vector.broadcast %cst_39 : f32 to vector<2x128xf32>
    %206 = arith.addf %205, %204 : vector<2x128xf32>
    %207 = arith.divf %205, %206 : vector<2x128xf32>
    %208 = math.tanh %202 : vector<2x128xf32>
    %209 = vector.extract_strided_slice %207 {offsets = [0, 0], sizes = [2, 32], strides = [1, 1]} : vector<2x128xf32> to vector<2x32xf32>
    %210 = vector.extract_strided_slice %207 {offsets = [0, 32], sizes = [2, 32], strides = [1, 1]} : vector<2x128xf32> to vector<2x32xf32>
    %211 = vector.extract_strided_slice %208 {offsets = [0, 64], sizes = [2, 32], strides = [1, 1]} : vector<2x128xf32> to vector<2x32xf32>
    %212 = vector.extract_strided_slice %207 {offsets = [0, 96], sizes = [2, 32], strides = [1, 1]} : vector<2x128xf32> to vector<2x32xf32>
    %213 = arith.mulf %210, %192 : vector<2x32xf32>
    %214 = arith.mulf %209, %211 : vector<2x32xf32>
    %215 = arith.addf %213, %214 : vector<2x32xf32>
    %216 = math.tanh %215 : vector<2x32xf32>
    %217 = arith.mulf %212, %216 : vector<2x32xf32>
    %218 = vector.extract_strided_slice %0 {offsets = [0, 9], sizes = [2, 1], strides = [1, 1]} : vector<2x10xf32> to vector<2x1xf32>
    %219 = vector.broadcast %218 : vector<2x1xf32> to vector<2x128xf32>
    %220 = vector.broadcast %2 : vector<1x128xf32> to vector<2x128xf32>
    %221 = arith.mulf %219, %220 : vector<2x128xf32>
    %222 = vector.broadcast %4 : vector<1x128xf32> to vector<2x128xf32>
    %223 = arith.addf %221, %222 : vector<2x128xf32>
    %cst_40 = arith.constant dense<0.000000e+00> : vector<2x128xf32>
    %224 = tpu.matmul %217, %3, %cst_40 {dimension_numbers = #tpu.dot_dimension_numbers<[1], [0], [0], [1], [0, 0, 1, 1], [], []>} : vector<2x32xf32>, vector<32x128xf32>, vector<2x128xf32> -> vector<2x128xf32>
    %225 = arith.addf %224, %223 : vector<2x128xf32>
    %226 = arith.negf %225 : vector<2x128xf32>
    %227 = math.exp %226 : vector<2x128xf32>
    %cst_41 = arith.constant 1.000000e+00 : f32
    %228 = vector.broadcast %cst_41 : f32 to vector<2x128xf32>
    %229 = arith.addf %228, %227 : vector<2x128xf32>
    %230 = arith.divf %228, %229 : vector<2x128xf32>
    %231 = math.tanh %225 : vector<2x128xf32>
    %232 = vector.extract_strided_slice %230 {offsets = [0, 0], sizes = [2, 32], strides = [1, 1]} : vector<2x128xf32> to vector<2x32xf32>
    %233 = vector.extract_strided_slice %230 {offsets = [0, 32], sizes = [2, 32], strides = [1, 1]} : vector<2x128xf32> to vector<2x32xf32>
    %234 = vector.extract_strided_slice %231 {offsets = [0, 64], sizes = [2, 32], strides = [1, 1]} : vector<2x128xf32> to vector<2x32xf32>
    %235 = vector.extract_strided_slice %230 {offsets = [0, 96], sizes = [2, 32], strides = [1, 1]} : vector<2x128xf32> to vector<2x32xf32>
    %236 = arith.mulf %233, %215 : vector<2x32xf32>
    %237 = arith.mulf %232, %234 : vector<2x32xf32>
    %238 = arith.addf %236, %237 : vector<2x32xf32>
    %239 = math.tanh %238 : vector<2x32xf32>
    %240 = arith.mulf %235, %239 : vector<2x32xf32>
    %241 = vector.extract_strided_slice %0 {offsets = [0, 9], sizes = [2, 1], strides = [1, 1]} : vector<2x10xf32> to vector<2x1xf32>
    %242 = vector.broadcast %241 : vector<2x1xf32> to vector<2x128xf32>
    %243 = vector.broadcast %5 : vector<1x128xf32> to vector<2x128xf32>
    %244 = arith.mulf %242, %243 : vector<2x128xf32>
    %245 = vector.broadcast %7 : vector<1x128xf32> to vector<2x128xf32>
    %246 = arith.addf %244, %245 : vector<2x128xf32>
    %247 = vector.shape_cast %9 : vector<1x128xf32> to vector<1x128xf32>
    %248 = vector.broadcast %247 : vector<1x128xf32> to vector<2x128xf32>
    %249 = tpu.iota {dimensions = array<i32: 1>} : vector<2x8xi32>
    %cst_42 = arith.constant 0.000000e+00 : f32
    %250 = vector.broadcast %cst_42 : f32 to vector<2x8xf32>
    %cst_43 = arith.constant dense<0.000000e+00> : vector<2x128xf32>
    %251 = tpu.matmul %240, %6, %cst_43 {dimension_numbers = #tpu.dot_dimension_numbers<[1], [0], [0], [1], [0, 0, 1, 1], [], []>} : vector<2x32xf32>, vector<32x128xf32>, vector<2x128xf32> -> vector<2x128xf32>
    %252 = arith.addf %251, %246 : vector<2x128xf32>
    %253 = arith.negf %252 : vector<2x128xf32>
    %254 = math.exp %253 : vector<2x128xf32>
    %cst_44 = arith.constant 1.000000e+00 : f32
    %255 = vector.broadcast %cst_44 : f32 to vector<2x128xf32>
    %256 = arith.addf %255, %254 : vector<2x128xf32>
    %257 = arith.divf %255, %256 : vector<2x128xf32>
    %258 = math.tanh %252 : vector<2x128xf32>
    %259 = vector.extract_strided_slice %257 {offsets = [0, 0], sizes = [2, 32], strides = [1, 1]} : vector<2x128xf32> to vector<2x32xf32>
    %260 = vector.extract_strided_slice %257 {offsets = [0, 32], sizes = [2, 32], strides = [1, 1]} : vector<2x128xf32> to vector<2x32xf32>
    %261 = vector.extract_strided_slice %258 {offsets = [0, 64], sizes = [2, 32], strides = [1, 1]} : vector<2x128xf32> to vector<2x32xf32>
    %262 = vector.extract_strided_slice %257 {offsets = [0, 96], sizes = [2, 32], strides = [1, 1]} : vector<2x128xf32> to vector<2x32xf32>
    %263 = arith.mulf %260, %238 : vector<2x32xf32>
    %264 = arith.mulf %259, %261 : vector<2x32xf32>
    %265 = arith.addf %263, %264 : vector<2x32xf32>
    %266 = math.tanh %265 : vector<2x32xf32>
    %267 = arith.mulf %262, %266 : vector<2x32xf32>
    %268 = vector.broadcast %10 : vector<1x32xf32> to vector<2x32xf32>
    %269 = arith.mulf %267, %268 : vector<2x32xf32>
    %cst_45 = arith.constant dense<0.000000e+00> : vector<2xf32>
    %270 = vector.multi_reduction <add>, %269, %cst_45 [1] : vector<2x32xf32> to vector<2xf32>
    %271 = vector.shape_cast %270 : vector<2xf32> to vector<2x1xf32>
    %272 = vector.broadcast %11 : vector<1x1xf32> to vector<2x1xf32>
    %273 = arith.addf %271, %272 : vector<2x1xf32>
    %c0_i32 = arith.constant 0 : i32
    %274 = vector.broadcast %c0_i32 : i32 to vector<2x8xi32>
    %275 = arith.cmpi eq, %249, %274 : vector<2x8xi32>
    %276 = vector.shape_cast %273 : vector<2x1xf32> to vector<2x1xf32>
    %277 = vector.broadcast %276 : vector<2x1xf32> to vector<2x8xf32>
    %278 = arith.select %275, %277, %250 : vector<2x8xi1>, vector<2x8xf32>
    %c0_46 = arith.constant 0 : index
    %279 = memref.load %arg0[%c0_46] : memref<8xi32, #tpu.memory_space<smem>>
    %c0_i32_47 = arith.constant 0 : i32
    %280 = arith.cmpi sgt, %279, %c0_i32_47 : i32
    %281 = vector.extract_strided_slice %1 {offsets = [0, 0], sizes = [2, 1], strides = [1, 1]} : vector<2x8xf32> to vector<2x1xf32>
    %282 = vector.broadcast %281 : vector<2x1xf32> to vector<2x128xf32>
    %283 = vector.broadcast %5 : vector<1x128xf32> to vector<2x128xf32>
    %284 = arith.mulf %282, %283 : vector<2x128xf32>
    %285 = vector.broadcast %7 : vector<1x128xf32> to vector<2x128xf32>
    %286 = arith.addf %284, %285 : vector<2x128xf32>
    %287 = arith.select %280, %6, %8 : vector<32x128xf32>
    %288 = arith.select %280, %286, %248 : vector<2x128xf32>
    %cst_48 = arith.constant dense<0.000000e+00> : vector<2x128xf32>
    %289 = tpu.matmul %267, %287, %cst_48 {dimension_numbers = #tpu.dot_dimension_numbers<[1], [0], [0], [1], [0, 0, 1, 1], [], []>} : vector<2x32xf32>, vector<32x128xf32>, vector<2x128xf32> -> vector<2x128xf32>
    %290 = arith.addf %289, %288 : vector<2x128xf32>
    %291 = arith.negf %290 : vector<2x128xf32>
    %292 = math.exp %291 : vector<2x128xf32>
    %cst_49 = arith.constant 1.000000e+00 : f32
    %293 = vector.broadcast %cst_49 : f32 to vector<2x128xf32>
    %294 = arith.addf %293, %292 : vector<2x128xf32>
    %295 = arith.divf %293, %294 : vector<2x128xf32>
    %296 = math.tanh %290 : vector<2x128xf32>
    %297 = vector.extract_strided_slice %295 {offsets = [0, 0], sizes = [2, 32], strides = [1, 1]} : vector<2x128xf32> to vector<2x32xf32>
    %298 = vector.extract_strided_slice %295 {offsets = [0, 32], sizes = [2, 32], strides = [1, 1]} : vector<2x128xf32> to vector<2x32xf32>
    %299 = vector.extract_strided_slice %296 {offsets = [0, 64], sizes = [2, 32], strides = [1, 1]} : vector<2x128xf32> to vector<2x32xf32>
    %300 = vector.extract_strided_slice %295 {offsets = [0, 96], sizes = [2, 32], strides = [1, 1]} : vector<2x128xf32> to vector<2x32xf32>
    %301 = arith.mulf %298, %265 : vector<2x32xf32>
    %302 = arith.mulf %297, %299 : vector<2x32xf32>
    %303 = arith.addf %301, %302 : vector<2x32xf32>
    %304 = math.tanh %303 : vector<2x32xf32>
    %305 = arith.mulf %300, %304 : vector<2x32xf32>
    %306 = vector.broadcast %10 : vector<1x32xf32> to vector<2x32xf32>
    %307 = arith.mulf %305, %306 : vector<2x32xf32>
    %cst_50 = arith.constant dense<0.000000e+00> : vector<2xf32>
    %308 = vector.multi_reduction <add>, %307, %cst_50 [1] : vector<2x32xf32> to vector<2xf32>
    %309 = vector.shape_cast %308 : vector<2xf32> to vector<2x1xf32>
    %310 = vector.broadcast %11 : vector<1x1xf32> to vector<2x1xf32>
    %311 = arith.addf %309, %310 : vector<2x1xf32>
    %c1_i32 = arith.constant 1 : i32
    %312 = vector.broadcast %c1_i32 : i32 to vector<2x8xi32>
    %313 = arith.cmpi eq, %249, %312 : vector<2x8xi32>
    %314 = vector.shape_cast %311 : vector<2x1xf32> to vector<2x1xf32>
    %315 = vector.broadcast %314 : vector<2x1xf32> to vector<2x8xf32>
    %316 = arith.select %313, %315, %278 : vector<2x8xi1>, vector<2x8xf32>
    %c1 = arith.constant 1 : index
    %317 = memref.load %arg0[%c1] : memref<8xi32, #tpu.memory_space<smem>>
    %c0_i32_51 = arith.constant 0 : i32
    %318 = arith.cmpi sgt, %317, %c0_i32_51 : i32
    %319 = vector.extract_strided_slice %1 {offsets = [0, 1], sizes = [2, 1], strides = [1, 1]} : vector<2x8xf32> to vector<2x1xf32>
    %320 = vector.broadcast %319 : vector<2x1xf32> to vector<2x128xf32>
    %321 = vector.broadcast %5 : vector<1x128xf32> to vector<2x128xf32>
    %322 = arith.mulf %320, %321 : vector<2x128xf32>
    %323 = vector.broadcast %7 : vector<1x128xf32> to vector<2x128xf32>
    %324 = arith.addf %322, %323 : vector<2x128xf32>
    %325 = arith.select %318, %6, %8 : vector<32x128xf32>
    %326 = arith.select %318, %324, %248 : vector<2x128xf32>
    %cst_52 = arith.constant dense<0.000000e+00> : vector<2x128xf32>
    %327 = tpu.matmul %305, %325, %cst_52 {dimension_numbers = #tpu.dot_dimension_numbers<[1], [0], [0], [1], [0, 0, 1, 1], [], []>} : vector<2x32xf32>, vector<32x128xf32>, vector<2x128xf32> -> vector<2x128xf32>
    %328 = arith.addf %327, %326 : vector<2x128xf32>
    %329 = arith.negf %328 : vector<2x128xf32>
    %330 = math.exp %329 : vector<2x128xf32>
    %cst_53 = arith.constant 1.000000e+00 : f32
    %331 = vector.broadcast %cst_53 : f32 to vector<2x128xf32>
    %332 = arith.addf %331, %330 : vector<2x128xf32>
    %333 = arith.divf %331, %332 : vector<2x128xf32>
    %334 = math.tanh %328 : vector<2x128xf32>
    %335 = vector.extract_strided_slice %333 {offsets = [0, 0], sizes = [2, 32], strides = [1, 1]} : vector<2x128xf32> to vector<2x32xf32>
    %336 = vector.extract_strided_slice %333 {offsets = [0, 32], sizes = [2, 32], strides = [1, 1]} : vector<2x128xf32> to vector<2x32xf32>
    %337 = vector.extract_strided_slice %334 {offsets = [0, 64], sizes = [2, 32], strides = [1, 1]} : vector<2x128xf32> to vector<2x32xf32>
    %338 = vector.extract_strided_slice %333 {offsets = [0, 96], sizes = [2, 32], strides = [1, 1]} : vector<2x128xf32> to vector<2x32xf32>
    %339 = arith.mulf %336, %303 : vector<2x32xf32>
    %340 = arith.mulf %335, %337 : vector<2x32xf32>
    %341 = arith.addf %339, %340 : vector<2x32xf32>
    %342 = math.tanh %341 : vector<2x32xf32>
    %343 = arith.mulf %338, %342 : vector<2x32xf32>
    %344 = vector.broadcast %10 : vector<1x32xf32> to vector<2x32xf32>
    %345 = arith.mulf %343, %344 : vector<2x32xf32>
    %cst_54 = arith.constant dense<0.000000e+00> : vector<2xf32>
    %346 = vector.multi_reduction <add>, %345, %cst_54 [1] : vector<2x32xf32> to vector<2xf32>
    %347 = vector.shape_cast %346 : vector<2xf32> to vector<2x1xf32>
    %348 = vector.broadcast %11 : vector<1x1xf32> to vector<2x1xf32>
    %349 = arith.addf %347, %348 : vector<2x1xf32>
    %c2_i32 = arith.constant 2 : i32
    %350 = vector.broadcast %c2_i32 : i32 to vector<2x8xi32>
    %351 = arith.cmpi eq, %249, %350 : vector<2x8xi32>
    %352 = vector.shape_cast %349 : vector<2x1xf32> to vector<2x1xf32>
    %353 = vector.broadcast %352 : vector<2x1xf32> to vector<2x8xf32>
    %354 = arith.select %351, %353, %316 : vector<2x8xi1>, vector<2x8xf32>
    %c2 = arith.constant 2 : index
    %355 = memref.load %arg0[%c2] : memref<8xi32, #tpu.memory_space<smem>>
    %c0_i32_55 = arith.constant 0 : i32
    %356 = arith.cmpi sgt, %355, %c0_i32_55 : i32
    %357 = vector.extract_strided_slice %1 {offsets = [0, 2], sizes = [2, 1], strides = [1, 1]} : vector<2x8xf32> to vector<2x1xf32>
    %358 = vector.broadcast %357 : vector<2x1xf32> to vector<2x128xf32>
    %359 = vector.broadcast %5 : vector<1x128xf32> to vector<2x128xf32>
    %360 = arith.mulf %358, %359 : vector<2x128xf32>
    %361 = vector.broadcast %7 : vector<1x128xf32> to vector<2x128xf32>
    %362 = arith.addf %360, %361 : vector<2x128xf32>
    %363 = arith.select %356, %6, %8 : vector<32x128xf32>
    %364 = arith.select %356, %362, %248 : vector<2x128xf32>
    %cst_56 = arith.constant dense<0.000000e+00> : vector<2x128xf32>
    %365 = tpu.matmul %343, %363, %cst_56 {dimension_numbers = #tpu.dot_dimension_numbers<[1], [0], [0], [1], [0, 0, 1, 1], [], []>} : vector<2x32xf32>, vector<32x128xf32>, vector<2x128xf32> -> vector<2x128xf32>
    %366 = arith.addf %365, %364 : vector<2x128xf32>
    %367 = arith.negf %366 : vector<2x128xf32>
    %368 = math.exp %367 : vector<2x128xf32>
    %cst_57 = arith.constant 1.000000e+00 : f32
    %369 = vector.broadcast %cst_57 : f32 to vector<2x128xf32>
    %370 = arith.addf %369, %368 : vector<2x128xf32>
    %371 = arith.divf %369, %370 : vector<2x128xf32>
    %372 = math.tanh %366 : vector<2x128xf32>
    %373 = vector.extract_strided_slice %371 {offsets = [0, 0], sizes = [2, 32], strides = [1, 1]} : vector<2x128xf32> to vector<2x32xf32>
    %374 = vector.extract_strided_slice %371 {offsets = [0, 32], sizes = [2, 32], strides = [1, 1]} : vector<2x128xf32> to vector<2x32xf32>
    %375 = vector.extract_strided_slice %372 {offsets = [0, 64], sizes = [2, 32], strides = [1, 1]} : vector<2x128xf32> to vector<2x32xf32>
    %376 = vector.extract_strided_slice %371 {offsets = [0, 96], sizes = [2, 32], strides = [1, 1]} : vector<2x128xf32> to vector<2x32xf32>
    %377 = arith.mulf %374, %341 : vector<2x32xf32>
    %378 = arith.mulf %373, %375 : vector<2x32xf32>
    %379 = arith.addf %377, %378 : vector<2x32xf32>
    %380 = math.tanh %379 : vector<2x32xf32>
    %381 = arith.mulf %376, %380 : vector<2x32xf32>
    %382 = vector.broadcast %10 : vector<1x32xf32> to vector<2x32xf32>
    %383 = arith.mulf %381, %382 : vector<2x32xf32>
    %cst_58 = arith.constant dense<0.000000e+00> : vector<2xf32>
    %384 = vector.multi_reduction <add>, %383, %cst_58 [1] : vector<2x32xf32> to vector<2xf32>
    %385 = vector.shape_cast %384 : vector<2xf32> to vector<2x1xf32>
    %386 = vector.broadcast %11 : vector<1x1xf32> to vector<2x1xf32>
    %387 = arith.addf %385, %386 : vector<2x1xf32>
    %c3_i32 = arith.constant 3 : i32
    %388 = vector.broadcast %c3_i32 : i32 to vector<2x8xi32>
    %389 = arith.cmpi eq, %249, %388 : vector<2x8xi32>
    %390 = vector.shape_cast %387 : vector<2x1xf32> to vector<2x1xf32>
    %391 = vector.broadcast %390 : vector<2x1xf32> to vector<2x8xf32>
    %392 = arith.select %389, %391, %354 : vector<2x8xi1>, vector<2x8xf32>
    %c3 = arith.constant 3 : index
    %393 = memref.load %arg0[%c3] : memref<8xi32, #tpu.memory_space<smem>>
    %c0_i32_59 = arith.constant 0 : i32
    %394 = arith.cmpi sgt, %393, %c0_i32_59 : i32
    %395 = vector.extract_strided_slice %1 {offsets = [0, 3], sizes = [2, 1], strides = [1, 1]} : vector<2x8xf32> to vector<2x1xf32>
    %396 = vector.broadcast %395 : vector<2x1xf32> to vector<2x128xf32>
    %397 = vector.broadcast %5 : vector<1x128xf32> to vector<2x128xf32>
    %398 = arith.mulf %396, %397 : vector<2x128xf32>
    %399 = vector.broadcast %7 : vector<1x128xf32> to vector<2x128xf32>
    %400 = arith.addf %398, %399 : vector<2x128xf32>
    %401 = arith.select %394, %6, %8 : vector<32x128xf32>
    %402 = arith.select %394, %400, %248 : vector<2x128xf32>
    %cst_60 = arith.constant dense<0.000000e+00> : vector<2x128xf32>
    %403 = tpu.matmul %381, %401, %cst_60 {dimension_numbers = #tpu.dot_dimension_numbers<[1], [0], [0], [1], [0, 0, 1, 1], [], []>} : vector<2x32xf32>, vector<32x128xf32>, vector<2x128xf32> -> vector<2x128xf32>
    %404 = arith.addf %403, %402 : vector<2x128xf32>
    %405 = arith.negf %404 : vector<2x128xf32>
    %406 = math.exp %405 : vector<2x128xf32>
    %cst_61 = arith.constant 1.000000e+00 : f32
    %407 = vector.broadcast %cst_61 : f32 to vector<2x128xf32>
    %408 = arith.addf %407, %406 : vector<2x128xf32>
    %409 = arith.divf %407, %408 : vector<2x128xf32>
    %410 = math.tanh %404 : vector<2x128xf32>
    %411 = vector.extract_strided_slice %409 {offsets = [0, 0], sizes = [2, 32], strides = [1, 1]} : vector<2x128xf32> to vector<2x32xf32>
    %412 = vector.extract_strided_slice %409 {offsets = [0, 32], sizes = [2, 32], strides = [1, 1]} : vector<2x128xf32> to vector<2x32xf32>
    %413 = vector.extract_strided_slice %410 {offsets = [0, 64], sizes = [2, 32], strides = [1, 1]} : vector<2x128xf32> to vector<2x32xf32>
    %414 = vector.extract_strided_slice %409 {offsets = [0, 96], sizes = [2, 32], strides = [1, 1]} : vector<2x128xf32> to vector<2x32xf32>
    %415 = arith.mulf %412, %379 : vector<2x32xf32>
    %416 = arith.mulf %411, %413 : vector<2x32xf32>
    %417 = arith.addf %415, %416 : vector<2x32xf32>
    %418 = math.tanh %417 : vector<2x32xf32>
    %419 = arith.mulf %414, %418 : vector<2x32xf32>
    %420 = vector.broadcast %10 : vector<1x32xf32> to vector<2x32xf32>
    %421 = arith.mulf %419, %420 : vector<2x32xf32>
    %cst_62 = arith.constant dense<0.000000e+00> : vector<2xf32>
    %422 = vector.multi_reduction <add>, %421, %cst_62 [1] : vector<2x32xf32> to vector<2xf32>
    %423 = vector.shape_cast %422 : vector<2xf32> to vector<2x1xf32>
    %424 = vector.broadcast %11 : vector<1x1xf32> to vector<2x1xf32>
    %425 = arith.addf %423, %424 : vector<2x1xf32>
    %c4_i32 = arith.constant 4 : i32
    %426 = vector.broadcast %c4_i32 : i32 to vector<2x8xi32>
    %427 = arith.cmpi eq, %249, %426 : vector<2x8xi32>
    %428 = vector.shape_cast %425 : vector<2x1xf32> to vector<2x1xf32>
    %429 = vector.broadcast %428 : vector<2x1xf32> to vector<2x8xf32>
    %430 = arith.select %427, %429, %392 : vector<2x8xi1>, vector<2x8xf32>
    %c4 = arith.constant 4 : index
    %431 = memref.load %arg0[%c4] : memref<8xi32, #tpu.memory_space<smem>>
    %c0_i32_63 = arith.constant 0 : i32
    %432 = arith.cmpi sgt, %431, %c0_i32_63 : i32
    %433 = vector.extract_strided_slice %1 {offsets = [0, 4], sizes = [2, 1], strides = [1, 1]} : vector<2x8xf32> to vector<2x1xf32>
    %434 = vector.broadcast %433 : vector<2x1xf32> to vector<2x128xf32>
    %435 = vector.broadcast %5 : vector<1x128xf32> to vector<2x128xf32>
    %436 = arith.mulf %434, %435 : vector<2x128xf32>
    %437 = vector.broadcast %7 : vector<1x128xf32> to vector<2x128xf32>
    %438 = arith.addf %436, %437 : vector<2x128xf32>
    %439 = arith.select %432, %6, %8 : vector<32x128xf32>
    %440 = arith.select %432, %438, %248 : vector<2x128xf32>
    %cst_64 = arith.constant dense<0.000000e+00> : vector<2x128xf32>
    %441 = tpu.matmul %419, %439, %cst_64 {dimension_numbers = #tpu.dot_dimension_numbers<[1], [0], [0], [1], [0, 0, 1, 1], [], []>} : vector<2x32xf32>, vector<32x128xf32>, vector<2x128xf32> -> vector<2x128xf32>
    %442 = arith.addf %441, %440 : vector<2x128xf32>
    %443 = arith.negf %442 : vector<2x128xf32>
    %444 = math.exp %443 : vector<2x128xf32>
    %cst_65 = arith.constant 1.000000e+00 : f32
    %445 = vector.broadcast %cst_65 : f32 to vector<2x128xf32>
    %446 = arith.addf %445, %444 : vector<2x128xf32>
    %447 = arith.divf %445, %446 : vector<2x128xf32>
    %448 = math.tanh %442 : vector<2x128xf32>
    %449 = vector.extract_strided_slice %447 {offsets = [0, 0], sizes = [2, 32], strides = [1, 1]} : vector<2x128xf32> to vector<2x32xf32>
    %450 = vector.extract_strided_slice %447 {offsets = [0, 32], sizes = [2, 32], strides = [1, 1]} : vector<2x128xf32> to vector<2x32xf32>
    %451 = vector.extract_strided_slice %448 {offsets = [0, 64], sizes = [2, 32], strides = [1, 1]} : vector<2x128xf32> to vector<2x32xf32>
    %452 = vector.extract_strided_slice %447 {offsets = [0, 96], sizes = [2, 32], strides = [1, 1]} : vector<2x128xf32> to vector<2x32xf32>
    %453 = arith.mulf %450, %417 : vector<2x32xf32>
    %454 = arith.mulf %449, %451 : vector<2x32xf32>
    %455 = arith.addf %453, %454 : vector<2x32xf32>
    %456 = math.tanh %455 : vector<2x32xf32>
    %457 = arith.mulf %452, %456 : vector<2x32xf32>
    %458 = vector.broadcast %10 : vector<1x32xf32> to vector<2x32xf32>
    %459 = arith.mulf %457, %458 : vector<2x32xf32>
    %cst_66 = arith.constant dense<0.000000e+00> : vector<2xf32>
    %460 = vector.multi_reduction <add>, %459, %cst_66 [1] : vector<2x32xf32> to vector<2xf32>
    %461 = vector.shape_cast %460 : vector<2xf32> to vector<2x1xf32>
    %462 = vector.broadcast %11 : vector<1x1xf32> to vector<2x1xf32>
    %463 = arith.addf %461, %462 : vector<2x1xf32>
    %c5_i32 = arith.constant 5 : i32
    %464 = vector.broadcast %c5_i32 : i32 to vector<2x8xi32>
    %465 = arith.cmpi eq, %249, %464 : vector<2x8xi32>
    %466 = vector.shape_cast %463 : vector<2x1xf32> to vector<2x1xf32>
    %467 = vector.broadcast %466 : vector<2x1xf32> to vector<2x8xf32>
    %468 = arith.select %465, %467, %430 : vector<2x8xi1>, vector<2x8xf32>
    %c5 = arith.constant 5 : index
    %469 = memref.load %arg0[%c5] : memref<8xi32, #tpu.memory_space<smem>>
    %c0_i32_67 = arith.constant 0 : i32
    %470 = arith.cmpi sgt, %469, %c0_i32_67 : i32
    %471 = vector.extract_strided_slice %1 {offsets = [0, 5], sizes = [2, 1], strides = [1, 1]} : vector<2x8xf32> to vector<2x1xf32>
    %472 = vector.broadcast %471 : vector<2x1xf32> to vector<2x128xf32>
    %473 = vector.broadcast %5 : vector<1x128xf32> to vector<2x128xf32>
    %474 = arith.mulf %472, %473 : vector<2x128xf32>
    %475 = vector.broadcast %7 : vector<1x128xf32> to vector<2x128xf32>
    %476 = arith.addf %474, %475 : vector<2x128xf32>
    %477 = arith.select %470, %6, %8 : vector<32x128xf32>
    %478 = arith.select %470, %476, %248 : vector<2x128xf32>
    %cst_68 = arith.constant dense<0.000000e+00> : vector<2x128xf32>
    %479 = tpu.matmul %457, %477, %cst_68 {dimension_numbers = #tpu.dot_dimension_numbers<[1], [0], [0], [1], [0, 0, 1, 1], [], []>} : vector<2x32xf32>, vector<32x128xf32>, vector<2x128xf32> -> vector<2x128xf32>
    %480 = arith.addf %479, %478 : vector<2x128xf32>
    %481 = arith.negf %480 : vector<2x128xf32>
    %482 = math.exp %481 : vector<2x128xf32>
    %cst_69 = arith.constant 1.000000e+00 : f32
    %483 = vector.broadcast %cst_69 : f32 to vector<2x128xf32>
    %484 = arith.addf %483, %482 : vector<2x128xf32>
    %485 = arith.divf %483, %484 : vector<2x128xf32>
    %486 = math.tanh %480 : vector<2x128xf32>
    %487 = vector.extract_strided_slice %485 {offsets = [0, 0], sizes = [2, 32], strides = [1, 1]} : vector<2x128xf32> to vector<2x32xf32>
    %488 = vector.extract_strided_slice %485 {offsets = [0, 32], sizes = [2, 32], strides = [1, 1]} : vector<2x128xf32> to vector<2x32xf32>
    %489 = vector.extract_strided_slice %486 {offsets = [0, 64], sizes = [2, 32], strides = [1, 1]} : vector<2x128xf32> to vector<2x32xf32>
    %490 = vector.extract_strided_slice %485 {offsets = [0, 96], sizes = [2, 32], strides = [1, 1]} : vector<2x128xf32> to vector<2x32xf32>
    %491 = arith.mulf %488, %455 : vector<2x32xf32>
    %492 = arith.mulf %487, %489 : vector<2x32xf32>
    %493 = arith.addf %491, %492 : vector<2x32xf32>
    %494 = math.tanh %493 : vector<2x32xf32>
    %495 = arith.mulf %490, %494 : vector<2x32xf32>
    %496 = vector.broadcast %10 : vector<1x32xf32> to vector<2x32xf32>
    %497 = arith.mulf %495, %496 : vector<2x32xf32>
    %cst_70 = arith.constant dense<0.000000e+00> : vector<2xf32>
    %498 = vector.multi_reduction <add>, %497, %cst_70 [1] : vector<2x32xf32> to vector<2xf32>
    %499 = vector.shape_cast %498 : vector<2xf32> to vector<2x1xf32>
    %500 = vector.broadcast %11 : vector<1x1xf32> to vector<2x1xf32>
    %501 = arith.addf %499, %500 : vector<2x1xf32>
    %c6_i32 = arith.constant 6 : i32
    %502 = vector.broadcast %c6_i32 : i32 to vector<2x8xi32>
    %503 = arith.cmpi eq, %249, %502 : vector<2x8xi32>
    %504 = vector.shape_cast %501 : vector<2x1xf32> to vector<2x1xf32>
    %505 = vector.broadcast %504 : vector<2x1xf32> to vector<2x8xf32>
    %506 = arith.select %503, %505, %468 : vector<2x8xi1>, vector<2x8xf32>
    %c6 = arith.constant 6 : index
    %507 = memref.load %arg0[%c6] : memref<8xi32, #tpu.memory_space<smem>>
    %c0_i32_71 = arith.constant 0 : i32
    %508 = arith.cmpi sgt, %507, %c0_i32_71 : i32
    %509 = vector.extract_strided_slice %1 {offsets = [0, 6], sizes = [2, 1], strides = [1, 1]} : vector<2x8xf32> to vector<2x1xf32>
    %510 = vector.broadcast %509 : vector<2x1xf32> to vector<2x128xf32>
    %511 = vector.broadcast %5 : vector<1x128xf32> to vector<2x128xf32>
    %512 = arith.mulf %510, %511 : vector<2x128xf32>
    %513 = vector.broadcast %7 : vector<1x128xf32> to vector<2x128xf32>
    %514 = arith.addf %512, %513 : vector<2x128xf32>
    %515 = arith.select %508, %6, %8 : vector<32x128xf32>
    %516 = arith.select %508, %514, %248 : vector<2x128xf32>
    %cst_72 = arith.constant dense<0.000000e+00> : vector<2x128xf32>
    %517 = tpu.matmul %495, %515, %cst_72 {dimension_numbers = #tpu.dot_dimension_numbers<[1], [0], [0], [1], [0, 0, 1, 1], [], []>} : vector<2x32xf32>, vector<32x128xf32>, vector<2x128xf32> -> vector<2x128xf32>
    %518 = arith.addf %517, %516 : vector<2x128xf32>
    %519 = arith.negf %518 : vector<2x128xf32>
    %520 = math.exp %519 : vector<2x128xf32>
    %cst_73 = arith.constant 1.000000e+00 : f32
    %521 = vector.broadcast %cst_73 : f32 to vector<2x128xf32>
    %522 = arith.addf %521, %520 : vector<2x128xf32>
    %523 = arith.divf %521, %522 : vector<2x128xf32>
    %524 = math.tanh %518 : vector<2x128xf32>
    %525 = vector.extract_strided_slice %523 {offsets = [0, 0], sizes = [2, 32], strides = [1, 1]} : vector<2x128xf32> to vector<2x32xf32>
    %526 = vector.extract_strided_slice %523 {offsets = [0, 32], sizes = [2, 32], strides = [1, 1]} : vector<2x128xf32> to vector<2x32xf32>
    %527 = vector.extract_strided_slice %524 {offsets = [0, 64], sizes = [2, 32], strides = [1, 1]} : vector<2x128xf32> to vector<2x32xf32>
    %528 = vector.extract_strided_slice %523 {offsets = [0, 96], sizes = [2, 32], strides = [1, 1]} : vector<2x128xf32> to vector<2x32xf32>
    %529 = arith.mulf %526, %493 : vector<2x32xf32>
    %530 = arith.mulf %525, %527 : vector<2x32xf32>
    %531 = arith.addf %529, %530 : vector<2x32xf32>
    %532 = math.tanh %531 : vector<2x32xf32>
    %533 = arith.mulf %528, %532 : vector<2x32xf32>
    %534 = vector.broadcast %10 : vector<1x32xf32> to vector<2x32xf32>
    %535 = arith.mulf %533, %534 : vector<2x32xf32>
    %cst_74 = arith.constant dense<0.000000e+00> : vector<2xf32>
    %536 = vector.multi_reduction <add>, %535, %cst_74 [1] : vector<2x32xf32> to vector<2xf32>
    %537 = vector.shape_cast %536 : vector<2xf32> to vector<2x1xf32>
    %538 = vector.broadcast %11 : vector<1x1xf32> to vector<2x1xf32>
    %539 = arith.addf %537, %538 : vector<2x1xf32>
    %c7_i32 = arith.constant 7 : i32
    %540 = vector.broadcast %c7_i32 : i32 to vector<2x8xi32>
    %541 = arith.cmpi eq, %249, %540 : vector<2x8xi32>
    %542 = vector.shape_cast %539 : vector<2x1xf32> to vector<2x1xf32>
    %543 = vector.broadcast %542 : vector<2x1xf32> to vector<2x8xf32>
    %544 = arith.select %541, %543, %506 : vector<2x8xi1>, vector<2x8xf32>
    %c0_75 = arith.constant 0 : index
    %c0_76 = arith.constant 0 : index
    %545 = vector.load %arg13[%c0_75, %c0_76] : memref<2x8xf32, #tpu.memory_space<vmem>>, vector<2x8xf32>
    tpu.vector_store %arg13[%c0_75, %c0_76], %544 {strides = array<i32>} : memref<2x8xf32, #tpu.memory_space<vmem>>, vector<2x8xf32>,
    return
  }
}

</mosaic_0001>

<bundles_post_ra>
// kernel: tpu_custom_call.1
= control target key start
LH: loop header
LB: loop body
LE: loop exit
PB: predicated region body
PF: predicated region fallthrough
CT: control target
= control target key end

     0   :  { %s3490_s0 = inlined_call_operand.vmem [shape: s32[8], index: 0, kind: input, shape index: {}]   ;;  %s3491_s1 = inlined_call_operand.vmem [shape: f32[2,10], index: 1, kind: input, shape index: {}]   ;;  %s3492_s2 = inlined_call_operand.vmem [shape: f32[2,8], index: 2, kind: input, shape index: {}]   ;;  %s3493_s3 = inlined_call_operand.vmem [shape: f32[1,128], index: 3, kind: input, shape index: {}]   ;;  %s3494_s4 = inlined_call_operand.hbm [shape: f32[32,128], index: 4, kind: input, shape index: {}]   ;;  %s3495_s5 = inlined_call_operand.vmem [shape: f32[1,128], index: 5, kind: input, shape index: {}]   ;;  %s3496_s6 = inlined_call_operand.vmem [shape: f32[1,128], index: 6, kind: input, shape index: {}]   ;;  %s3497_s7 = inlined_call_operand.hbm [shape: f32[32,128], index: 7, kind: input, shape index: {}]   ;;  %s3498_s8 = inlined_call_operand.vmem [shape: f32[1,128], index: 8, kind: input, shape index: {}]   ;;  %s3499_s9 = inlined_call_operand.hbm [shape: f32[32,128], index: 9, kind: input, shape index: {}]   ;;  %s3500_s10 = inlined_call_operand.vmem [shape: f32[1,128], index: 10, kind: input, shape index: {}]   ;;  %s3501_s11 = inlined_call_operand.vmem [shape: f32[1,32], index: 11, kind: input, shape index: {}]   ;;  %s3502_s12 = inlined_call_operand.<no memory space> [shape: f32[1,1], index: 12, kind: input, shape index: {}]   ;;  %s3503_s13 = inlined_call_operand.hbm [shape: f32[2,8], index: 13, kind: output, shape index: {}]  }
   0x1   :  { %v18_v0 = vstv %s3502_s12 }
   0x2   :  { %19 = vst [vmem:[#allocation2] sm:$0x1] %v18_v0 }
   0x3   :  { %20 = vsyncpa [#allocation6], 0 }
   0x4   :  { %21 = vsyncpa [#allocation4], 0 }
   0x5   :  { %22 = vsyncpa [#allocation9], 0 }
   0x6   :  { %23 = vsyncpa [#allocation5], 0  ;;  %s30_s29 = sshll.u32 %s3490_s0, 4  ;;  %s2805_s30 = smov [#allocation8]   ;;  %s31_s29 = int_to_ptr.vmem [resolvable:$true] %s30_s29 }
   0x7   :  { %s61_s14 = sshll.u32 %s2805_s30, 4  ;;  %s62_s14 = int_to_ptr.vmem [resolvable:$true] %s61_s14 }
   0x8   :  { %s2713_s15 = scalar_lea.vmem %s62_s14, 512  ;;  %p2718_p1 = scmp.lt.s32.totalorder %s62_s14, %s62_s14 }
   0x9   :  { %p2714_p0 = scmp.ne.s32.totalorder %s62_s14, %s2713_s15  ;;  %p2719_p2 = scmp.lt.s32.totalorder %s2713_s15, %s2713_s15 }
   0xb   :  { %p2720_p3 = por %p2719_p2, %p2718_p1 }
   0xd   :  { %p2721_p4 = pnand %p2720_p3, %p2714_p0 }
   0xf   :  { %2724 = shalt.err (!%p2721_p4)
}
  0x10   :  { %s2806_s12 = smov 128   ;;  %s2807_s16 = smov 8  }
  0x11   :  { %67 = dma.hbm_to_vmem [thread:$0]  %s3497_s7, 512, %s62_s14, [#allocation9], %s2806_s12, %s2806_s12, %s2807_s16  }
  0x12   :  { %s2725_s0 = scalar_lea.vmem %s31_s29, 16  ;;  %p2730_p6 = scmp.lt.s32.totalorder %s31_s29, %s31_s29 }
  0x13   :  { %p2726_p5 = scmp.ne.s32.totalorder %s31_s29, %s2725_s0  ;;  %p2731_p7 = scmp.lt.s32.totalorder %s2725_s0, %s2725_s0 }
  0x15   :  { %p2732_p8 = por %p2731_p7, %p2730_p6 }
  0x17   :  { %p2733_p9 = pnand %p2732_p8, %p2726_p5 }
  0x19   :  { %2736 = shalt.err (!%p2733_p9)
}
  0x1a   :  { %s2808_s19 = smov [#allocation3]   ;;  %s2809_s20 = smov [#allocation7]  }
  0x1b   :  { %33 = dma.vmem_to_smem %s31_s29, 16, %s2808_s19, [#allocation6]  }
  0x1c   :  { %s45_s21 = sshll.u32 %s2809_s20, 4  ;;  %s2810_s22 = smov [#allocation10]   ;;  %s46_s21 = int_to_ptr.vmem [resolvable:$true] %s45_s21 }
  0x1d   :  { %s75_s23 = sshll.u32 %s2810_s22, 4  ;;  %s2745_s24 = scalar_lea.vmem %s46_s21, 512  ;;  %s76_s23 = int_to_ptr.vmem [resolvable:$true] %s75_s23 }
  0x1e   :  { %p2746_p10 = scmp.ne.s32.totalorder %s46_s21, %s2745_s24  ;;  %p2750_p11 = scmp.lt.s32.totalorder %s46_s21, %s46_s21 }
  0x1f   :  { %p2751_p12 = scmp.lt.s32.totalorder %s2745_s24, %s2745_s24 }
  0x21   :  { %p2752_p13 = por %p2751_p12, %p2750_p11 }
  0x23   :  { %p2753_p0 = pnand %p2752_p13, %p2746_p10 }
  0x25   :  { %2756 = shalt.err (!%p2753_p0)
}
  0x26   :  { %51 = dma.hbm_to_vmem [thread:$0]  %s3494_s4, 512, %s46_s21, [#allocation4], %s2806_s12, %s2806_s12, %s2807_s16  }
  0x27   :  { %s2765_s26 = scalar_lea.vmem %s76_s23, 512  ;;  %p2770_p2 = scmp.lt.s32.totalorder %s76_s23, %s76_s23 }
  0x28   :  { %p2766_p1 = scmp.ne.s32.totalorder %s76_s23, %s2765_s26  ;;  %p2771_p3 = scmp.lt.s32.totalorder %s2765_s26, %s2765_s26 }
  0x2a   :  { %p2772_p4 = por %p2771_p3, %p2770_p2 }
  0x2c   :  { %p2773_p5 = pnand %p2772_p4, %p2766_p1 }
  0x2e   :  { %2776 = shalt.err (!%p2773_p5)
}
  0x2f   :  { %81 = dma.hbm_to_vmem [thread:$0]  %s3499_s9, 512, %s76_s23, [#allocation9], %s2806_s12, %s2806_s12, %s2807_s16  }
  0x30   :  { %2797 = dma.done.wait [#allocation6], 16  }
  0x31   :  { %2798 = vsyncadd [#allocation6], 4294967280 }
  0x32   :  { %2799 = dma.done.wait [#allocation4], 512  }
  0x33   :  { %2800 = vsyncadd [#allocation4], 4294966784 }
  0x34   :  { %2801 = dma.done.wait [#allocation9], 1024  }
  0x35   :  { %2802 = vsyncadd [#allocation9], 4294966272 }
  0x36   :  { %100 = sfence }
  0x37   :  { %v2924_v1 = vld [vmem:[%s3491_s1] sm:$0x3]  ;;  %v2811_v2 = vmov 0   ;;  %s2812_s1 = smov 64   ;;  %v2814_v19 = vmov 0.0   ;;  %v2948_v20 = vld [vmem:[#allocation7 + $0x10] sm:$0xff] }
  0x38   :  { %2542 = vset.pattern.permute.xlu0 %v2811_v2  ;;  %v2931_v3 = vld [vmem:[%s3493_s3] ss:$0 sm:$0xff]  ;;  %s2813_s3 = smov 32   ;;  %2333 = vmatprep.subr.mxu0 %v2814_v19  ;;  %vm2815_vm0 = vmmov 0   ;;  %v2955_v21 = vld [vmem:[#allocation7 + $0x8] sm:$0xff]  ;;  %v2961_v22 = vld [vmem:[#allocation7] sm:$0xff] }
  0x39   :  { %124 = vperm.xlu0 %2542, %v2924_v1   ;;  %v2936_v4 = vld [vmem:[%s3495_s5] ss:$0 sm:$0xff]  ;;  %2341 = vmatprep.mubr.msk.f32.mxu0 %vm2815_vm0, %v2814_v19  ;;  %v2816_v24 = vmov 1   ;;  %vm174_vm1 = vcmask 261120   ;;  %v2817_v45 = vmov 2   ;;  %s2233_s21 = sld [smem:[#allocation3 + $0x2]] }
  0x3a   :  { %v2945_v18 = vld [vmem:[#allocation7 + $0x18] sm:$0xff]  ;;  %2344 = vmatprep.subr.mxu1 %v2814_v19  ;;  %2352 = vmatprep.mubr.msk.f32.mxu1 %vm2815_vm0, %v2814_v19  ;;  %s2236_s23 = sld [smem:[#allocation3 + $0x3]]  ;;  %s2825_s30 = smov 96   ;;  %vm1245_vm9 = vcmask 254976  }
  0x3b   :  { %2334 = vmatpush3.msra.mxu0 %v2945_v18  ;;  %2345 = vmatpush3.msra.mxu1 %v2945_v18  ;;  %s2239_s7 = sld [smem:[#allocation3 + $0x4]] }
  0x3c   :  { %2335 = vmatprep.subr.mxu0 %v2814_v19  ;;  %2346 = vmatprep.subr.mxu1 %v2814_v19  ;;  %s2242_s26 = sld [smem:[#allocation3 + $0x5]] }
  0x3d   :  { %2336 = vmatpush3.msra.mxu0 %v2948_v20  ;;  %2347 = vmatpush3.msra.mxu1 %v2948_v20  ;;  %s2245_s28 = sld [smem:[#allocation3 + $0x6]] }
  0x3e   :  { %2337 = vmatprep.subr.mxu0 %v2814_v19  ;;  %2348 = vmatprep.subr.mxu1 %v2814_v19 }
  0x3f   :  { %2338 = vmatpush3.msra.mxu0 %v2955_v21  ;;  %2349 = vmatpush3.msra.mxu1 %v2955_v21  ;;  %p1527_p8 = scmp.gt.s32.totalorder %s2233_s21, 0 }
  0x40   :  { %2339 = vmatprep.subr.mxu0 %v2814_v19  ;;  %2350 = vmatprep.subr.mxu1 %v2814_v19  ;;  %p1658_p9 = scmp.gt.s32.totalorder %s2236_s23, 0 }
  0x41   :  { %2340 = vmatpush3.msra.mxu0 %v2961_v22  ;;  %2351 = vmatpush3.msra.mxu1 %v2961_v22  ;;  %s1534_s22 = scalar_select %p1527_p8, 1, 0 }
  0x42   :  { %2355 = vmatprep.subr.mxu0 %v2814_v19  ;;  %2366 = vmatprep.subr.mxu1 %v2814_v19  ;;  %s1665_s24 = scalar_select %p1658_p9, 1, 0 }
  0x43   :  { %2543 = vset.pattern.permute.xlu1 %v2816_v24  ;;  %2544 = vset.pattern.permute.xlu0 %v2817_v45  ;;  %p1789_p10 = scmp.gt.s32.totalorder %s2239_s7, 0  ;;  %p1920_p11 = scmp.gt.s32.totalorder %s2242_s26, 0 }
  0x44   :  { %p2051_p12 = scmp.gt.s32.totalorder %s2245_s28, 0 }
  0x45   :  { %s1796_s25 = scalar_select %p1789_p10, 1, 0 }
  0x46   :  { %s1927_s27 = scalar_select %p1920_p11, 1, 0 }
  0x47   :  { %s2058_s14 = scalar_select %p2051_p12, 1, 0 }
  0xb4   :  { %v125_v5 = vpop.permute.xlu0 %124 }
  0xb5   :  { %v133_v6 = vmul.f32 %v2931_v3, %v125_v5 }
  0xb7   :  { %v140_v7 = vadd.f32 %v2936_v4, %v133_v6  ;;  %v2818_v6 = vmov 3  }
  0xb9   :  { %2561 = vtanh.f32 %v140_v7  ;;  %v2202_v9 = vmul.f32 -1.442695, %v140_v7 }
  0xbb   :  { %2563 = vpow2.f32 %v2202_v9 }
  0xc6   :  { %v2562_v8 = vpop.eup %2561 }
  0xc7   :  { %150 = vrot.lane.b32.xlu0 %v2562_v8, %s2812_s1 }
  0xc8   :  { %v2564_v10 = vpop.eup %2563 }
  0xc9   :  { %v144_v11 = vadd.f32 1.0, %v2564_v10 }
  0xcb   :  { %2565 = vrcp.f32 %v144_v11 }
  0xd8   :  { %v2566_v12 = vpop.eup %2565 }
  0xd9   :  { %v148_v15 = vmul.f32 0.0, %v2566_v12 }
 0x139   :  { %v151_v13 = vpop.permute.xlu0 %150 }
 0x13a   :  { %v153_v14 = vmul.f32 %v2566_v12, %v151_v13 }
 0x13c   :  { %155 = vrot.lane.b32.xlu1 %v153_v14, %s2813_s3 }
 0x1ae   :  { %v156_v16 = vpop.permute.xlu1 %155 }
 0x1af   :  { %v2942_v17 = vadd.f32 %v156_v16, %v148_v15 }
 0x1b1   :  { %2567 = vtanh.f32 %v2942_v17 }
 0x1be   :  { %v2568_v23 = vpop.eup %2567 }
 0x1bf   :  { %161 = vrot.lane.b32.xlu1 %v2568_v23, %s2812_s1 }
 0x1c3   :  { %166 = vperm.xlu1 %2543, %v2924_v1  }
 0x1c7   :  { %2559 = vset.pattern.permute.xlu1 %v2811_v2 }
 0x231   :  { %v162_v25 = vpop.permute.xlu1 %161 }
 0x232   :  { %v164_v26 = vmul.f32 %v2566_v12, %v162_v25 }
 0x234   :  { %172 = vrot.lane.b32.xlu0 %v164_v26, %s2813_s3 }
 0x23e   :  { %v167_v28 = vpop.permute.xlu1 %166 }
 0x23f   :  { %v169_v29 = vmul.f32 %v2931_v3, %v167_v28 }
 0x241   :  { %v170_v30 = vadd.f32 %v2936_v4, %v169_v29 }
 0x2a6   :  { %v173_v27 = vpop.permute.xlu0 %172 }
 0x2a7   :  { %2342 = vmatmul.mubr.msk.f32.vlgmr.msra.gmra.mxu0 %vm174_vm1, %v173_v27 }
 0x2a8   :  { %2356 = vmatpush3.msra.mxu0 %v2945_v18  ;;  %2363 = vmatprep.mubr.msk.f32.mxu0 %vm2815_vm0, %v2814_v19 }
 0x2a9   :  { %2357 = vmatprep.subr.mxu0 %v2814_v19 }
 0x2aa   :  { %2358 = vmatpush3.msra.mxu0 %v2948_v20 }
 0x2ab   :  { %2359 = vmatprep.subr.mxu0 %v2814_v19 }
 0x2ac   :  { %2360 = vmatpush3.msra.mxu0 %v2955_v21 }
 0x2ad   :  { %2361 = vmatprep.subr.mxu0 %v2814_v19 }
 0x2ae   :  { %2362 = vmatpush3.msra.mxu0 %v2961_v22 }
 0x2af   :  { %2377 = vmatprep.subr.mxu0 %v2814_v19 }
 0x367   :  { %v243_v31 = vpop.f32.mrf.mxu0 }
 0x368   :  { %v244_v32 = vadd.f32 %v243_v31, %v170_v30 }
 0x369   :  { %v2343_v33 = vpop.f32.mrf.mxu0 }
 0x36a   :  { %2569 = vtanh.f32 %v244_v32  ;;  %v2204_v35 = vmul.f32 -1.442695, %v244_v32  ;;  %v2819_v33 = vmov 4  }
 0x36c   :  { %2571 = vpow2.f32 %v2204_v35 }
 0x377   :  { %v2570_v34 = vpop.eup %2569 }
 0x378   :  { %256 = vrot.lane.b32.xlu0 %v2570_v34, %s2812_s1 }
 0x379   :  { %v2572_v36 = vpop.eup %2571 }
 0x37a   :  { %v250_v37 = vadd.f32 1.0, %v2572_v36 }
 0x37c   :  { %2573 = vrcp.f32 %v250_v37 }
 0x389   :  { %v2574_v38 = vpop.eup %2573 }
 0x38a   :  { %v254_v41 = vmul.f32 %v2574_v38, %v2942_v17 }
 0x3ea   :  { %v257_v39 = vpop.permute.xlu0 %256 }
 0x3eb   :  { %v259_v40 = vmul.f32 %v2574_v38, %v257_v39 }
 0x3ed   :  { %261 = vrot.lane.b32.xlu1 %v259_v40, %s2813_s3 }
 0x45f   :  { %v262_v42 = vpop.permute.xlu1 %261 }
 0x460   :  { %v264_v43 = vadd.f32 %v262_v42, %v254_v41 }
 0x462   :  { %2575 = vtanh.f32 %v264_v43 }
 0x46f   :  { %v2576_v44 = vpop.eup %2575 }
 0x470   :  { %267 = vrot.lane.b32.xlu0 %v2576_v44, %s2812_s1 }
 0x474   :  { %272 = vperm.xlu0 %2544, %v2924_v1  }
 0x478   :  { %2545 = vset.pattern.permute.xlu0 %v2818_v6 }
 0x4e2   :  { %v268_v46 = vpop.permute.xlu0 %267 }
 0x4e3   :  { %v270_v47 = vmul.f32 %v2574_v38, %v268_v46 }
 0x4e5   :  { %278 = vrot.lane.b32.xlu1 %v270_v47, %s2813_s3 }
 0x4ef   :  { %v273_v49 = vpop.permute.xlu0 %272 }
 0x4f0   :  { %v275_v50 = vmul.f32 %v2931_v3, %v273_v49 }
 0x4f2   :  { %v276_v51 = vadd.f32 %v2936_v4, %v275_v50 }
 0x557   :  { %v279_v48 = vpop.permute.xlu1 %278 }
 0x558   :  { %2353 = vmatmul.mubr.msk.f32.vlgmr.msra.gmra.mxu1 %vm174_vm1, %v279_v48 }
 0x559   :  { %2367 = vmatpush3.msra.mxu1 %v2945_v18  ;;  %2374 = vmatprep.mubr.msk.f32.mxu1 %vm2815_vm0, %v2814_v19 }
 0x55a   :  { %2368 = vmatprep.subr.mxu1 %v2814_v19 }
 0x55b   :  { %2369 = vmatpush3.msra.mxu1 %v2948_v20 }
 0x55c   :  { %2370 = vmatprep.subr.mxu1 %v2814_v19 }
 0x55d   :  { %2371 = vmatpush3.msra.mxu1 %v2955_v21 }
 0x55e   :  { %2372 = vmatprep.subr.mxu1 %v2814_v19 }
 0x55f   :  { %2373 = vmatpush3.msra.mxu1 %v2961_v22 }
 0x560   :  { %2388 = vmatprep.subr.mxu1 %v2814_v19 }
 0x618   :  { %v348_v52 = vpop.f32.mrf.mxu1 }
 0x619   :  { %v349_v53 = vadd.f32 %v348_v52, %v276_v51 }
 0x61a   :  { %v2354_v54 = vpop.f32.mrf.mxu1 }
 0x61b   :  { %2577 = vtanh.f32 %v349_v53  ;;  %v2206_v56 = vmul.f32 -1.442695, %v349_v53 }
 0x61d   :  { %2579 = vpow2.f32 %v2206_v56 }
 0x628   :  { %v2578_v55 = vpop.eup %2577 }
 0x629   :  { %361 = vrot.lane.b32.xlu1 %v2578_v55, %s2812_s1  ;;  %v2820_v55 = vmov 5  }
 0x62a   :  { %v2580_v57 = vpop.eup %2579 }
 0x62b   :  { %v355_v58 = vadd.f32 1.0, %v2580_v57 }
 0x62d   :  { %2581 = vrcp.f32 %v355_v58 }
 0x63a   :  { %v2582_v59 = vpop.eup %2581 }
 0x63b   :  { %v359_v62 = vmul.f32 %v2582_v59, %v264_v43 }
 0x69b   :  { %v362_v60 = vpop.permute.xlu1 %361 }
 0x69c   :  { %v364_v61 = vmul.f32 %v2582_v59, %v362_v60 }
 0x69e   :  { %366 = vrot.lane.b32.xlu1 %v364_v61, %s2813_s3 }
 0x710   :  { %v367_v63 = vpop.permute.xlu1 %366 }
 0x711   :  { %v369_v0 = vadd.f32 %v367_v63, %v359_v62 }
 0x713   :  { %2583 = vtanh.f32 %v369_v0 }
 0x720   :  { %v2584_v5 = vpop.eup %2583 }
 0x721   :  { %372 = vrot.lane.b32.xlu0 %v2584_v5, %s2812_s1 }
 0x725   :  { %377 = vperm.xlu0 %2545, %v2924_v1  }
 0x729   :  { %2546 = vset.pattern.permute.xlu0 %v2819_v33 }
 0x793   :  { %v373_v7 = vpop.permute.xlu0 %372 }
 0x794   :  { %v375_v8 = vmul.f32 %v2582_v59, %v373_v7 }
 0x796   :  { %383 = vrot.lane.b32.xlu1 %v375_v8, %s2813_s3 }
 0x7a0   :  { %v378_v10 = vpop.permute.xlu0 %377 }
 0x7a1   :  { %v380_v11 = vmul.f32 %v2931_v3, %v378_v10 }
 0x7a3   :  { %v381_v12 = vadd.f32 %v2936_v4, %v380_v11 }
 0x808   :  { %v384_v9 = vpop.permute.xlu1 %383 }
 0x809   :  { %2364 = vmatmul.mubr.msk.f32.vlgmr.msra.gmra.mxu0 %vm174_vm1, %v384_v9 }
 0x80a   :  { %2378 = vmatpush3.msra.mxu0 %v2945_v18  ;;  %2385 = vmatprep.mubr.msk.f32.mxu0 %vm2815_vm0, %v2814_v19 }
 0x80b   :  { %2379 = vmatprep.subr.mxu0 %v2814_v19 }
 0x80c   :  { %2380 = vmatpush3.msra.mxu0 %v2948_v20 }
 0x80d   :  { %2381 = vmatprep.subr.mxu0 %v2814_v19 }
 0x80e   :  { %2382 = vmatpush3.msra.mxu0 %v2955_v21 }
 0x80f   :  { %2383 = vmatprep.subr.mxu0 %v2814_v19 }
 0x810   :  { %2384 = vmatpush3.msra.mxu0 %v2961_v22 }
 0x811   :  { %2399 = vmatprep.subr.mxu0 %v2814_v19 }
 0x8c9   :  { %v453_v13 = vpop.f32.mrf.mxu0 }
 0x8ca   :  { %v454_v14 = vadd.f32 %v453_v13, %v381_v12 }
 0x8cb   :  { %v2365_v15 = vpop.f32.mrf.mxu0 }
 0x8cc   :  { %2585 = vtanh.f32 %v454_v14  ;;  %v2208_v17 = vmul.f32 -1.442695, %v454_v14 }
 0x8ce   :  { %2587 = vpow2.f32 %v2208_v17  ;;  %v2821_v17 = vmov 6  }
 0x8d9   :  { %v2586_v16 = vpop.eup %2585 }
 0x8da   :  { %466 = vrot.lane.b32.xlu1 %v2586_v16, %s2812_s1 }
 0x8db   :  { %v2588_v23 = vpop.eup %2587 }
 0x8dc   :  { %v460_v25 = vadd.f32 1.0, %v2588_v23 }
 0x8de   :  { %2589 = vrcp.f32 %v460_v25 }
 0x8eb   :  { %v2590_v26 = vpop.eup %2589 }
 0x8ec   :  { %v464_v29 = vmul.f32 %v2590_v26, %v369_v0 }
 0x94c   :  { %v467_v27 = vpop.permute.xlu1 %466 }
 0x94d   :  { %v469_v28 = vmul.f32 %v2590_v26, %v467_v27 }
 0x94f   :  { %471 = vrot.lane.b32.xlu1 %v469_v28, %s2813_s3 }
 0x9c1   :  { %v472_v30 = vpop.permute.xlu1 %471 }
 0x9c2   :  { %v474_v31 = vadd.f32 %v472_v30, %v464_v29 }
 0x9c4   :  { %2591 = vtanh.f32 %v474_v31 }
 0x9d1   :  { %v2592_v32 = vpop.eup %2591 }
 0x9d2   :  { %477 = vrot.lane.b32.xlu0 %v2592_v32, %s2812_s1 }
 0x9d6   :  { %482 = vperm.xlu0 %2546, %v2924_v1  }
 0x9da   :  { %2547 = vset.pattern.permute.xlu0 %v2820_v55 }
 0xa44   :  { %v478_v34 = vpop.permute.xlu0 %477 }
 0xa45   :  { %v480_v35 = vmul.f32 %v2590_v26, %v478_v34 }
 0xa47   :  { %488 = vrot.lane.b32.xlu1 %v480_v35, %s2813_s3 }
 0xa51   :  { %v483_v37 = vpop.permute.xlu0 %482 }
 0xa52   :  { %v485_v38 = vmul.f32 %v2931_v3, %v483_v37 }
 0xa54   :  { %v486_v39 = vadd.f32 %v2936_v4, %v485_v38 }
 0xab9   :  { %v489_v36 = vpop.permute.xlu1 %488 }
 0xaba   :  { %2375 = vmatmul.mubr.msk.f32.vlgmr.msra.gmra.mxu1 %vm174_vm1, %v489_v36 }
 0xabb   :  { %2389 = vmatpush3.msra.mxu1 %v2945_v18  ;;  %2396 = vmatprep.mubr.msk.f32.mxu1 %vm2815_vm0, %v2814_v19 }
 0xabc   :  { %2390 = vmatprep.subr.mxu1 %v2814_v19 }
 0xabd   :  { %2391 = vmatpush3.msra.mxu1 %v2948_v20 }
 0xabe   :  { %2392 = vmatprep.subr.mxu1 %v2814_v19 }
 0xabf   :  { %2393 = vmatpush3.msra.mxu1 %v2955_v21 }
 0xac0   :  { %2394 = vmatprep.subr.mxu1 %v2814_v19 }
 0xac1   :  { %2395 = vmatpush3.msra.mxu1 %v2961_v22 }
 0xac2   :  { %2410 = vmatprep.subr.mxu1 %v2814_v19 }
 0xb7a   :  { %v558_v40 = vpop.f32.mrf.mxu1 }
 0xb7b   :  { %v559_v41 = vadd.f32 %v558_v40, %v486_v39 }
 0xb7c   :  { %v2376_v42 = vpop.f32.mrf.mxu1 }
 0xb7d   :  { %2593 = vtanh.f32 %v559_v41  ;;  %v2210_v44 = vmul.f32 -1.442695, %v559_v41 }
 0xb7f   :  { %2595 = vpow2.f32 %v2210_v44 }
 0xb8a   :  { %v2594_v43 = vpop.eup %2593 }
 0xb8b   :  { %571 = vrot.lane.b32.xlu1 %v2594_v43, %s2812_s1 }
 0xb8c   :  { %v2596_v46 = vpop.eup %2595 }
 0xb8d   :  { %v565_v47 = vadd.f32 1.0, %v2596_v46  ;;  %v2822_v46 = vmov 7  }
 0xb8f   :  { %2597 = vrcp.f32 %v565_v47 }
 0xb9c   :  { %v2598_v48 = vpop.eup %2597 }
 0xb9d   :  { %v569_v51 = vmul.f32 %v2598_v48, %v474_v31 }
 0xbfd   :  { %v572_v49 = vpop.permute.xlu1 %571 }
 0xbfe   :  { %v574_v50 = vmul.f32 %v2598_v48, %v572_v49 }
 0xc00   :  { %576 = vrot.lane.b32.xlu1 %v574_v50, %s2813_s3 }
 0xc72   :  { %v577_v52 = vpop.permute.xlu1 %576 }
 0xc73   :  { %v579_v53 = vadd.f32 %v577_v52, %v569_v51 }
 0xc75   :  { %2599 = vtanh.f32 %v579_v53 }
 0xc82   :  { %v2600_v54 = vpop.eup %2599 }
 0xc83   :  { %582 = vrot.lane.b32.xlu0 %v2600_v54, %s2812_s1 }
 0xc87   :  { %587 = vperm.xlu0 %2547, %v2924_v1  }
 0xc8b   :  { %2548 = vset.pattern.permute.xlu0 %v2821_v17 }
 0xcf5   :  { %v583_v56 = vpop.permute.xlu0 %582 }
 0xcf6   :  { %v585_v57 = vmul.f32 %v2598_v48, %v583_v56 }
 0xcf8   :  { %593 = vrot.lane.b32.xlu1 %v585_v57, %s2813_s3 }
 0xd02   :  { %v588_v59 = vpop.permute.xlu0 %587 }
 0xd03   :  { %v590_v60 = vmul.f32 %v2931_v3, %v588_v59 }
 0xd05   :  { %v591_v61 = vadd.f32 %v2936_v4, %v590_v60 }
 0xd6a   :  { %v594_v58 = vpop.permute.xlu1 %593 }
 0xd6b   :  { %2386 = vmatmul.mubr.msk.f32.vlgmr.msra.gmra.mxu0 %vm174_vm1, %v594_v58 }
 0xd6c   :  { %2400 = vmatpush3.msra.mxu0 %v2945_v18  ;;  %2407 = vmatprep.mubr.msk.f32.mxu0 %vm2815_vm0, %v2814_v19 }
 0xd6d   :  { %2401 = vmatprep.subr.mxu0 %v2814_v19 }
 0xd6e   :  { %2402 = vmatpush3.msra.mxu0 %v2948_v20 }
 0xd6f   :  { %2403 = vmatprep.subr.mxu0 %v2814_v19 }
 0xd70   :  { %2404 = vmatpush3.msra.mxu0 %v2955_v21 }
 0xd71   :  { %2405 = vmatprep.subr.mxu0 %v2814_v19 }
 0xd72   :  { %2406 = vmatpush3.msra.mxu0 %v2961_v22 }
 0xd73   :  { %2421 = vmatprep.subr.mxu0 %v2814_v19 }
 0xe2b   :  { %v663_v62 = vpop.f32.mrf.mxu0 }
 0xe2c   :  { %v664_v63 = vadd.f32 %v663_v62, %v591_v61 }
 0xe2d   :  { %v2387_v0 = vpop.f32.mrf.mxu0 }
 0xe2e   :  { %2601 = vtanh.f32 %v664_v63  ;;  %v2212_v7 = vmul.f32 -1.442695, %v664_v63  ;;  %v2823_v0 = vmov 8  }
 0xe30   :  { %2603 = vpow2.f32 %v2212_v7 }
 0xe3b   :  { %v2602_v5 = vpop.eup %2601 }
 0xe3c   :  { %676 = vrot.lane.b32.xlu1 %v2602_v5, %s2812_s1 }
 0xe3d   :  { %v2604_v8 = vpop.eup %2603 }
 0xe3e   :  { %v670_v9 = vadd.f32 1.0, %v2604_v8 }
 0xe40   :  { %2605 = vrcp.f32 %v670_v9 }
 0xe4d   :  { %v2606_v10 = vpop.eup %2605 }
 0xe4e   :  { %v674_v13 = vmul.f32 %v2606_v10, %v579_v53 }
 0xeae   :  { %v677_v11 = vpop.permute.xlu1 %676 }
 0xeaf   :  { %v679_v12 = vmul.f32 %v2606_v10, %v677_v11 }
 0xeb1   :  { %681 = vrot.lane.b32.xlu1 %v679_v12, %s2813_s3 }
 0xf23   :  { %v682_v14 = vpop.permute.xlu1 %681 }
 0xf24   :  { %v684_v15 = vadd.f32 %v682_v14, %v674_v13 }
 0xf26   :  { %2607 = vtanh.f32 %v684_v15 }
 0xf33   :  { %v2608_v16 = vpop.eup %2607 }
 0xf34   :  { %687 = vrot.lane.b32.xlu0 %v2608_v16, %s2812_s1 }
 0xf38   :  { %692 = vperm.xlu0 %2548, %v2924_v1  }
 0xf3c   :  { %2549 = vset.pattern.permute.xlu0 %v2822_v46 }
 0xfa6   :  { %v688_v23 = vpop.permute.xlu0 %687 }
 0xfa7   :  { %v690_v25 = vmul.f32 %v2606_v10, %v688_v23 }
 0xfa9   :  { %698 = vrot.lane.b32.xlu1 %v690_v25, %s2813_s3 }
 0xfb3   :  { %v693_v27 = vpop.permute.xlu0 %692 }
 0xfb4   :  { %v695_v28 = vmul.f32 %v2931_v3, %v693_v27 }
 0xfb6   :  { %v696_v29 = vadd.f32 %v2936_v4, %v695_v28 }
0x101b   :  { %v699_v26 = vpop.permute.xlu1 %698 }
0x101c   :  { %2397 = vmatmul.mubr.msk.f32.vlgmr.msra.gmra.mxu1 %vm174_vm1, %v699_v26 }
0x101d   :  { %2411 = vmatpush3.msra.mxu1 %v2945_v18  ;;  %2418 = vmatprep.mubr.msk.f32.mxu1 %vm2815_vm0, %v2814_v19 }
0x101e   :  { %2412 = vmatprep.subr.mxu1 %v2814_v19 }
0x101f   :  { %2413 = vmatpush3.msra.mxu1 %v2948_v20 }
0x1020   :  { %2414 = vmatprep.subr.mxu1 %v2814_v19 }
0x1021   :  { %2415 = vmatpush3.msra.mxu1 %v2955_v21 }
0x1022   :  { %2416 = vmatprep.subr.mxu1 %v2814_v19 }
0x1023   :  { %2417 = vmatpush3.msra.mxu1 %v2961_v22 }
0x1024   :  { %2432 = vmatprep.subr.mxu1 %v2814_v19 }
0x10dc   :  { %v768_v30 = vpop.f32.mrf.mxu1 }
0x10dd   :  { %v769_v31 = vadd.f32 %v768_v30, %v696_v29 }
0x10de   :  { %v2398_v32 = vpop.f32.mrf.mxu1 }
0x10df   :  { %2609 = vtanh.f32 %v769_v31  ;;  %v2214_v35 = vmul.f32 -1.442695, %v769_v31 }
0x10e1   :  { %2611 = vpow2.f32 %v2214_v35 }
0x10ec   :  { %v2610_v34 = vpop.eup %2609 }
0x10ed   :  { %781 = vrot.lane.b32.xlu1 %v2610_v34, %s2812_s1  ;;  %v2824_v34 = vmov 9  }
0x10ee   :  { %v2612_v36 = vpop.eup %2611 }
0x10ef   :  { %v775_v37 = vadd.f32 1.0, %v2612_v36 }
0x10f1   :  { %2613 = vrcp.f32 %v775_v37 }
0x10fe   :  { %v2614_v38 = vpop.eup %2613 }
0x10ff   :  { %v779_v41 = vmul.f32 %v2614_v38, %v684_v15 }
0x115f   :  { %v782_v39 = vpop.permute.xlu1 %781 }
0x1160   :  { %v784_v40 = vmul.f32 %v2614_v38, %v782_v39 }
0x1162   :  { %786 = vrot.lane.b32.xlu1 %v784_v40, %s2813_s3 }
0x11d4   :  { %v787_v42 = vpop.permute.xlu1 %786 }
0x11d5   :  { %v789_v43 = vadd.f32 %v787_v42, %v779_v41 }
0x11d7   :  { %2615 = vtanh.f32 %v789_v43 }
0x11e4   :  { %v2616_v44 = vpop.eup %2615 }
0x11e5   :  { %792 = vrot.lane.b32.xlu0 %v2616_v44, %s2812_s1 }
0x11e9   :  { %797 = vperm.xlu0 %2549, %v2924_v1  }
0x11ed   :  { %2550 = vset.pattern.permute.xlu0 %v2823_v0 }
0x1257   :  { %v793_v47 = vpop.permute.xlu0 %792 }
0x1258   :  { %v795_v48 = vmul.f32 %v2614_v38, %v793_v47 }
0x125a   :  { %803 = vrot.lane.b32.xlu1 %v795_v48, %s2813_s3 }
0x1264   :  { %v798_v50 = vpop.permute.xlu0 %797 }
0x12cc   :  { %v804_v49 = vpop.permute.xlu1 %803 }
0x12cd   :  { %2408 = vmatmul.mubr.msk.f32.vlgmr.msra.gmra.mxu0 %vm174_vm1, %v804_v49 }
0x12ce   :  { %2422 = vmatpush3.msra.mxu0 %v2945_v18  ;;  %2429 = vmatprep.mubr.msk.f32.mxu0 %vm2815_vm0, %v2814_v19  ;;  %v800_v18 = vmul.f32 %v2931_v3, %v798_v50 }
0x12cf   :  { %2423 = vmatprep.subr.mxu0 %v2814_v19 }
0x12d0   :  { %2424 = vmatpush3.msra.mxu0 %v2948_v20  ;;  %v801_v51 = vadd.f32 %v2936_v4, %v800_v18 }
0x12d1   :  { %2425 = vmatprep.subr.mxu0 %v2814_v19 }
0x12d2   :  { %2426 = vmatpush3.msra.mxu0 %v2955_v21 }
0x12d3   :  { %2427 = vmatprep.subr.mxu0 %v2814_v19 }
0x12d4   :  { %2428 = vmatpush3.msra.mxu0 %v2961_v22 }
0x12d5   :  { %2443 = vmatprep.subr.mxu0 %v2814_v19 }
0x138d   :  { %v873_v52 = vpop.f32.mrf.mxu0 }
0x138e   :  { %v874_v53 = vadd.f32 %v873_v52, %v801_v51  ;;  %v3130_v51 = vld [vmem:[#allocation8 + $0x18] sm:$0xff]  ;;  %v3132_v52 = vld [vmem:[#allocation8 + $0x10] sm:$0xff] }
0x138f   :  { %v2409_v54 = vpop.f32.mrf.mxu0 }
0x1390   :  { %2617 = vtanh.f32 %v874_v53  ;;  %v2216_v56 = vmul.f32 -1.442695, %v874_v53  ;;  %v3136_v53 = vld [vmem:[#allocation8 + $0x8] sm:$0xff]  ;;  %v3140_v54 = vld [vmem:[#allocation8] sm:$0xff] }
0x1392   :  { %2619 = vpow2.f32 %v2216_v56 }
0x139d   :  { %v2618_v20 = vpop.eup %2617 }
0x139e   :  { %886 = vrot.lane.b32.xlu1 %v2618_v20, %s2812_s1 }
0x139f   :  { %v2620_v21 = vpop.eup %2619 }
0x13a0   :  { %v880_v57 = vadd.f32 1.0, %v2620_v21 }
0x13a2   :  { %2621 = vrcp.f32 %v880_v57 }
0x13af   :  { %v2622_v22 = vpop.eup %2621 }
0x13b0   :  { %v884_v60 = vmul.f32 %v2622_v22, %v789_v43 }
0x1410   :  { %v887_v58 = vpop.permute.xlu1 %886 }
0x1411   :  { %v889_v59 = vmul.f32 %v2622_v22, %v887_v58 }
0x1413   :  { %891 = vrot.lane.b32.xlu1 %v889_v59, %s2813_s3  ;;  %v3160_v59 = vld [vmem:[%s3498_s8] ss:$0 sm:$0xff] }
0x1485   :  { %v892_v61 = vpop.permute.xlu1 %891 }
0x1486   :  { %v894_v62 = vadd.f32 %v892_v61, %v884_v60 }
0x1488   :  { %2623 = vtanh.f32 %v894_v62 }
0x1495   :  { %v2624_v63 = vpop.eup %2623 }
0x1496   :  { %897 = vrot.lane.b32.xlu0 %v2624_v63, %s2812_s1 }
0x149a   :  { %902 = vperm.xlu0 %2550, %v2924_v1  }
0x149e   :  { %2551 = vset.pattern.permute.xlu0 %v2824_v34  ;;  %v3201_v34 = vld [vmem:[%s3492_s2] sm:$0x3] }
0x1508   :  { %v898_v5 = vpop.permute.xlu0 %897 }
0x1509   :  { %v900_v7 = vmul.f32 %v2622_v22, %v898_v5  ;;  %v3154_v22 = vld [vmem:[%s3496_s6] ss:$0 sm:$0xff]  ;;  %s1263_s6 = sld [smem:[#allocation3]] }
0x150b   :  { %908 = vrot.lane.b32.xlu1 %v900_v7, %s2813_s3 }
0x150f   :  { %p1264_p6 = scmp.gt.s32.totalorder %s1263_s6, 0 }
0x1511   :  { %s1272_s8 = scalar_select %p1264_p6, 1, 0 }
0x1515   :  { %v903_v9 = vpop.permute.xlu0 %902 }
0x1516   :  { %v905_v10 = vmul.f32 %v2931_v3, %v903_v9 }
0x1518   :  { %v906_v11 = vadd.f32 %v2936_v4, %v905_v10 }
0x157d   :  { %v909_v8 = vpop.permute.xlu1 %908 }
0x157e   :  { %2419 = vmatmul.mubr.msk.f32.vlgmr.msra.gmra.mxu1 %vm174_vm1, %v909_v8 }
0x157f   :  { %2440 = vmatprep.mubr.msk.f32.mxu1 %vm2815_vm0, %v2814_v19  ;;  %2433 = vmatpush3.msra.mxu1 %v3130_v51 }
0x1580   :  { %2434 = vmatprep.subr.mxu1 %v2814_v19 }
0x1581   :  { %2435 = vmatpush3.msra.mxu1 %v3132_v52 }
0x1582   :  { %2436 = vmatprep.subr.mxu1 %v2814_v19 }
0x1583   :  { %2437 = vmatpush3.msra.mxu1 %v3136_v53 }
0x1584   :  { %2438 = vmatprep.subr.mxu1 %v2814_v19 }
0x1585   :  { %2439 = vmatpush3.msra.mxu1 %v3140_v54 }
0x1586   :  { %2454 = vmatprep.subr.mxu1 %v2814_v19 }
0x163e   :  { %v978_v12 = vpop.f32.mrf.mxu1 }
0x163f   :  { %v979_v13 = vadd.f32 %v978_v12, %v906_v11 }
0x1640   :  { %v2420_v14 = vpop.f32.mrf.mxu1 }
0x1641   :  { %2625 = vtanh.f32 %v979_v13  ;;  %v2218_v16 = vmul.f32 -1.442695, %v979_v13 }
0x1643   :  { %2627 = vpow2.f32 %v2218_v16  ;;  %v3167_v16 = vld [vmem:[#allocation10 + $0x10] sm:$0xff] }
0x164e   :  { %v2626_v15 = vpop.eup %2625 }
0x164f   :  { %991 = vrot.lane.b32.xlu1 %v2626_v15, %s2812_s1  ;;  %v3165_v15 = vld [vmem:[#allocation10 + $0x18] sm:$0xff] }
0x1650   :  { %v2628_v23 = vpop.eup %2627 }
0x1651   :  { %v985_v25 = vadd.f32 1.0, %v2628_v23 }
0x1653   :  { %2629 = vrcp.f32 %v985_v25  ;;  %v1273_v25 = vstv %s1272_s8 }
0x1654   :  { %vm3170_vm2 = vcmp.eq.s32.totalorder %v1273_v25, 1 }
0x1660   :  { %v2630_v26 = vpop.eup %2629 }
0x1661   :  { %v989_v29 = vmul.f32 %v2630_v26, %v894_v62 }
0x16c1   :  { %v992_v27 = vpop.permute.xlu1 %991 }
0x16c2   :  { %v994_v28 = vmul.f32 %v2630_v26, %v992_v27  ;;  %v3174_v27 = vld [vmem:[#allocation10 + $0x8] sm:$0xff] }
0x16c4   :  { %996 = vrot.lane.b32.xlu1 %v994_v28, %s2813_s3  ;;  %v1278_v28 = vsel %vm3170_vm2, %v3130_v51, %v3165_v15 }
0x1736   :  { %v997_v30 = vpop.permute.xlu1 %996 }
0x1737   :  { %v999_v31 = vadd.f32 %v997_v30, %v989_v29  ;;  %v1277_v29 = vsel %vm3170_vm2, %v3132_v52, %v3167_v16  ;;  %v3184_v30 = vld [vmem:[#allocation10] sm:$0xff] }
0x1739   :  { %2631 = vtanh.f32 %v999_v31 }
0x1746   :  { %v2632_v32 = vpop.eup %2631 }
0x1747   :  { %1002 = vrot.lane.b32.xlu0 %v2632_v32, %s2812_s1  ;;  %v1275_v32 = vsel %vm3170_vm2, %v3140_v54, %v3184_v30 }
0x174b   :  { %1007 = vperm.xlu0 %2551, %v2924_v1  }
0x174f   :  { %2552 = vset.pattern.permute.xlu0 %v2811_v2 }
0x17b9   :  { %v1003_v35 = vpop.permute.xlu0 %1002 }
0x17ba   :  { %v1005_v36 = vmul.f32 %v2630_v26, %v1003_v35 }
0x17bc   :  { %1013 = vrot.lane.b32.xlu1 %v1005_v36, %s2813_s3 }
0x17c6   :  { %v1008_v38 = vpop.permute.xlu0 %1007 }
0x17c7   :  { %v1010_v39 = vmul.f32 %v2931_v3, %v1008_v38  ;;  %v1117_v58 = vmul.f32 %v3154_v22, %v1008_v38 }
0x17c9   :  { %v1011_v40 = vadd.f32 %v2936_v4, %v1010_v39  ;;  %v1124_v60 = vadd.f32 %v3160_v59, %v1117_v58 }
0x182e   :  { %v1014_v37 = vpop.permute.xlu1 %1013 }
0x182f   :  { %2430 = vmatmul.mubr.msk.f32.vlgmr.msra.gmra.mxu0 %vm174_vm1, %v1014_v37 }
0x1830   :  { %2451 = vmatprep.mubr.msk.f32.mxu0 %vm2815_vm0, %v2814_v19  ;;  %2444 = vmatpush3.msra.mxu0 %v1278_v28 }
0x1831   :  { %2445 = vmatprep.subr.mxu0 %v2814_v19 }
0x1832   :  { %2446 = vmatpush3.msra.mxu0 %v1277_v29 }
0x1833   :  { %2447 = vmatprep.subr.mxu0 %v2814_v19 }
0x18ef   :  { %v1083_v41 = vpop.f32.mrf.mxu0 }
0x18f0   :  { %v1084_v42 = vadd.f32 %v1083_v41, %v1011_v40 }
0x18f1   :  { %v2431_v1 = vpop.f32.mrf.mxu0 }
0x18f2   :  { %2633 = vtanh.f32 %v1084_v42  ;;  %v2220_v44 = vmul.f32 -1.442695, %v1084_v42 }
0x18f4   :  { %2635 = vpow2.f32 %v2220_v44 }
0x18ff   :  { %v2634_v43 = vpop.eup %2633 }
0x1900   :  { %1096 = vrot.lane.b32.xlu1 %v2634_v43, %s2812_s1 }
0x1901   :  { %v2636_v46 = vpop.eup %2635 }
0x1902   :  { %v1090_v47 = vadd.f32 1.0, %v2636_v46 }
0x1904   :  { %2637 = vrcp.f32 %v1090_v47 }
0x1911   :  { %v2638_v48 = vpop.eup %2637 }
0x1912   :  { %v1094_v3 = vmul.f32 %v2638_v48, %v999_v31  ;;  %v1276_v31 = vsel %vm3170_vm2, %v3136_v53, %v3174_v27 }
0x1913   :  { %2448 = vmatpush3.msra.mxu0 %v1276_v31 }
0x1914   :  { %2449 = vmatprep.subr.mxu0 %v2814_v19 }
0x1915   :  { %2450 = vmatpush3.msra.mxu0 %v1275_v32 }
0x1916   :  { %2465 = vmatprep.subr.mxu0 %v2814_v19 }
0x1972   :  { %v1097_v49 = vpop.permute.xlu1 %1096 }
0x1973   :  { %v1099_v50 = vmul.f32 %v2638_v48, %v1097_v49 }
0x1975   :  { %1101 = vrot.lane.b32.xlu1 %v1099_v50, %s2813_s3 }
0x19e7   :  { %v1102_v18 = vpop.permute.xlu1 %1101 }
0x19e8   :  { %v1104_v4 = vadd.f32 %v1102_v18, %v1094_v3 }
0x19ea   :  { %2639 = vtanh.f32 %v1104_v4 }
0x19f7   :  { %v2640_v20 = vpop.eup %2639 }
0x19f8   :  { %1107 = vrot.lane.b32.xlu0 %v2640_v20, %s2812_s1 }
0x1a6a   :  { %v1108_v56 = vpop.permute.xlu0 %1107 }
0x1a6b   :  { %v1110_v21 = vmul.f32 %v2638_v48, %v1108_v56 }
0x1a6d   :  { %1134 = vrot.lane.b32.xlu1 %v1110_v21, %s2813_s3 }
0x1adf   :  { %v1135_v57 = vpop.permute.xlu1 %1134 }
0x1ae0   :  { %2441 = vmatmul.mubr.msk.f32.vlgmr.msra.gmra.mxu1 %vm174_vm1, %v1135_v57 }
0x1ae1   :  { %2462 = vmatprep.mubr.msk.f32.mxu1 %vm2815_vm0, %v2814_v19 }
0x1ba0   :  { %v1204_v61 = vpop.f32.mrf.mxu1 }
0x1ba1   :  { %v1205_v62 = vadd.f32 %v1204_v61, %v1124_v60 }
0x1ba2   :  { %v2442_v63 = vpop.f32.mrf.mxu1 }
0x1ba3   :  { %2641 = vtanh.f32 %v1205_v62  ;;  %v2225_v5 = vmul.f32 -1.442695, %v1205_v62 }
0x1ba5   :  { %2643 = vpow2.f32 %v2225_v5 }
0x1bb0   :  { %v2642_v0 = vpop.eup %2641 }
0x1bb1   :  { %1217 = vrot.lane.b32.xlu0 %v2642_v0, %s2812_s1 }
0x1bb2   :  { %v2644_v7 = vpop.eup %2643 }
0x1bb3   :  { %v1211_v8 = vadd.f32 1.0, %v2644_v7 }
0x1bb5   :  { %2645 = vrcp.f32 %v1211_v8 }
0x1bc2   :  { %v2646_v9 = vpop.eup %2645 }
0x1bc3   :  { %v1215_v12 = vmul.f32 %v2646_v9, %v1104_v4 }
0x1c23   :  { %v1218_v10 = vpop.permute.xlu0 %1217 }
0x1c24   :  { %v1220_v11 = vmul.f32 %v2646_v9, %v1218_v10 }
0x1c26   :  { %1222 = vrot.lane.b32.xlu1 %v1220_v11, %s2813_s3 }
0x1c98   :  { %v1223_v13 = vpop.permute.xlu1 %1222 }
0x1c99   :  { %v1225_v14 = vadd.f32 %v1223_v13, %v1215_v12 }
0x1c9b   :  { %2647 = vtanh.f32 %v1225_v14 }
0x1ca8   :  { %v2648_v23 = vpop.eup %2647 }
0x1ca9   :  { %1228 = vrot.lane.b32.xlu0 %v2648_v23, %s2812_s1 }
0x1cad   :  { %1267 = vperm.xlu0 %2552, %v3201_v34  }
0x1cb1   :  { %2553 = vset.pattern.permute.xlu0 %v2816_v24  ;;  %v3217_v24 = vld [vmem:[%s3500_s10] ss:$0 sm:$0xff]  ;;  %s2230_s10 = sld [smem:[#allocation3 + $0x1]] }
0x1cb7   :  { %p1396_p7 = scmp.gt.s32.totalorder %s2230_s10, 0 }
0x1cb9   :  { %s1403_s20 = scalar_select %p1396_p7, 1, 0 }
0x1cbb   :  { %v1404_v21 = vstv %s1403_s20 }
0x1cbc   :  { %vm3225_vm3 = vcmp.eq.s32.totalorder %v1404_v21, 1 }
0x1cbd   :  { %v1409_v58 = vsel %vm3225_vm3, %v3130_v51, %v3165_v15  ;;  %v1408_v60 = vsel %vm3225_vm3, %v3132_v52, %v3167_v16  ;;  %v1407_v61 = vsel %vm3225_vm3, %v3136_v53, %v3174_v27  ;;  %v1406_v62 = vsel %vm3225_vm3, %v3140_v54, %v3184_v30 }
0x1cbe   :  { %2455 = vmatpush3.msra.mxu1 %v1409_v58 }
0x1cbf   :  { %2456 = vmatprep.subr.mxu1 %v2814_v19 }
0x1cc0   :  { %2457 = vmatpush3.msra.mxu1 %v1408_v60 }
0x1cc1   :  { %2458 = vmatprep.subr.mxu1 %v2814_v19 }
0x1cc2   :  { %2459 = vmatpush3.msra.mxu1 %v1407_v61 }
0x1cc3   :  { %2460 = vmatprep.subr.mxu1 %v2814_v19 }
0x1cc4   :  { %2461 = vmatpush3.msra.mxu1 %v1406_v62 }
0x1cc5   :  { %2476 = vmatprep.subr.mxu1 %v2814_v19 }
0x1d1b   :  { %v1229_v35 = vpop.permute.xlu0 %1228 }
0x1d1c   :  { %v3205_v36 = vmul.f32 %v2646_v9, %v1229_v35 }
0x1d1e   :  { %1281 = vrot.lane.b32.xlu1 %v3205_v36, %s2813_s3 }
0x1d28   :  { %v1268_v38 = vpop.permute.xlu0 %1267 }
0x1d29   :  { %v1270_v39 = vmul.f32 %v3154_v22, %v1268_v38  ;;  %v1535_v38 = vstv %s1534_s22 }
0x1d2a   :  { %vm3266_vm4 = vcmp.eq.s32.totalorder %v1535_v38, 1 }
0x1d2b   :  { %v1271_v40 = vadd.f32 %v3160_v59, %v1270_v39 }
0x1d2d   :  { %v1279_v41 = vsel %vm3170_vm2, %v1271_v40, %v3217_v24  ;;  %v1540_v40 = vsel %vm3266_vm4, %v3130_v51, %v3165_v15  ;;  %vm2181_vm2 = vcmask 58368  }
0x1d90   :  { %v1282_v37 = vpop.permute.xlu1 %1281 }
0x1d91   :  { %2452 = vmatmul.mubr.msk.f32.vlgmr.msra.gmra.mxu0 %vm174_vm1, %v1282_v37 }
0x1d92   :  { %2473 = vmatprep.mubr.msk.f32.mxu0 %vm2815_vm0, %v2814_v19  ;;  %2466 = vmatpush3.msra.mxu0 %v1540_v40 }
0x1d93   :  { %2467 = vmatprep.subr.mxu0 %v2814_v19 }
0x1e51   :  { %v1351_v42 = vpop.f32.mrf.mxu0 }
0x1e52   :  { %v1352_v1 = vadd.f32 %v1351_v42, %v1279_v41  ;;  %v1539_v41 = vsel %vm3266_vm4, %v3132_v52, %v3167_v16  ;;  %v1538_v42 = vsel %vm3266_vm4, %v3136_v53, %v3174_v27 }
0x1e53   :  { %v2453_v43 = vpop.f32.mrf.mxu0  ;;  %2468 = vmatpush3.msra.mxu0 %v1539_v41 }
0x1e54   :  { %2649 = vtanh.f32 %v1352_v1  ;;  %v2229_v46 = vmul.f32 -1.442695, %v1352_v1  ;;  %2469 = vmatprep.subr.mxu0 %v2814_v19  ;;  %v1537_v1 = vsel %vm3266_vm4, %v3140_v54, %v3184_v30 }
0x1e55   :  { %2470 = vmatpush3.msra.mxu0 %v1538_v42 }
0x1e56   :  { %2651 = vpow2.f32 %v2229_v46  ;;  %2471 = vmatprep.subr.mxu0 %v2814_v19 }
0x1e57   :  { %2472 = vmatpush3.msra.mxu0 %v1537_v1 }
0x1e58   :  { %2487 = vmatprep.subr.mxu0 %v2814_v19 }
0x1e61   :  { %v2650_v44 = vpop.eup %2649 }
0x1e62   :  { %1364 = vrot.lane.b32.xlu1 %v2650_v44, %s2812_s1 }
0x1e63   :  { %v2652_v47 = vpop.eup %2651 }
0x1e64   :  { %v1358_v48 = vadd.f32 1.0, %v2652_v47 }
0x1e66   :  { %2653 = vrcp.f32 %v1358_v48 }
0x1e73   :  { %v2654_v49 = vpop.eup %2653 }
0x1e74   :  { %v1362_v18 = vmul.f32 %v2654_v49, %v1225_v14 }
0x1ed4   :  { %v1365_v50 = vpop.permute.xlu1 %1364 }
0x1ed5   :  { %v1367_v3 = vmul.f32 %v2654_v49, %v1365_v50 }
0x1ed7   :  { %1369 = vrot.lane.b32.xlu1 %v1367_v3, %s2813_s3 }
0x1f49   :  { %v1370_v4 = vpop.permute.xlu1 %1369 }
0x1f4a   :  { %v1372_v20 = vadd.f32 %v1370_v4, %v1362_v18 }
0x1f4c   :  { %2655 = vtanh.f32 %v1372_v20 }
0x1f59   :  { %v2656_v56 = vpop.eup %2655 }
0x1f5a   :  { %1375 = vrot.lane.b32.xlu0 %v2656_v56, %s2812_s1 }
0x1f5e   :  { %1398 = vperm.xlu0 %2553, %v3201_v34  }
0x1f62   :  { %2554 = vset.pattern.permute.xlu0 %v2817_v45 }
0x1fcc   :  { %v1376_v63 = vpop.permute.xlu0 %1375 }
0x1fcd   :  { %v3251_v0 = vmul.f32 %v2654_v49, %v1376_v63 }
0x1fcf   :  { %1412 = vrot.lane.b32.xlu1 %v3251_v0, %s2813_s3 }
0x1fd9   :  { %v1399_v7 = vpop.permute.xlu0 %1398 }
0x1fda   :  { %v1401_v8 = vmul.f32 %v3154_v22, %v1399_v7  ;;  %v1666_v7 = vstv %s1665_s24 }
0x1fdb   :  { %vm3307_vm5 = vcmp.eq.s32.totalorder %v1666_v7, 1 }
0x1fdc   :  { %v1402_v9 = vadd.f32 %v3160_v59, %v1401_v8 }
0x1fde   :  { %v1410_v45 = vsel %vm3225_vm3, %v1402_v9, %v3217_v24  ;;  %v1671_v9 = vsel %vm3307_vm5, %v3130_v51, %v3165_v15 }
0x2041   :  { %v1413_v5 = vpop.permute.xlu1 %1412 }
0x2042   :  { %2463 = vmatmul.mubr.msk.f32.vlgmr.msra.gmra.mxu1 %vm174_vm1, %v1413_v5 }
0x2043   :  { %2484 = vmatprep.mubr.msk.f32.mxu1 %vm2815_vm0, %v2814_v19  ;;  %2477 = vmatpush3.msra.mxu1 %v1671_v9 }
0x2044   :  { %2478 = vmatprep.subr.mxu1 %v2814_v19 }
0x2102   :  { %v1482_v10 = vpop.f32.mrf.mxu1 }
0x2103   :  { %v1483_v11 = vadd.f32 %v1482_v10, %v1410_v45  ;;  %v1670_v45 = vsel %vm3307_vm5, %v3132_v52, %v3167_v16  ;;  %v1669_v10 = vsel %vm3307_vm5, %v3136_v53, %v3174_v27 }
0x2104   :  { %v2464_v12 = vpop.f32.mrf.mxu1  ;;  %2479 = vmatpush3.msra.mxu1 %v1670_v45 }
0x2105   :  { %2657 = vtanh.f32 %v1483_v11  ;;  %v2232_v14 = vmul.f32 -1.442695, %v1483_v11  ;;  %2480 = vmatprep.subr.mxu1 %v2814_v19  ;;  %v1668_v11 = vsel %vm3307_vm5, %v3140_v54, %v3184_v30 }
0x2106   :  { %2481 = vmatpush3.msra.mxu1 %v1669_v10 }
0x2107   :  { %2659 = vpow2.f32 %v2232_v14  ;;  %2482 = vmatprep.subr.mxu1 %v2814_v19 }
0x2108   :  { %2483 = vmatpush3.msra.mxu1 %v1668_v11 }
0x2109   :  { %2498 = vmatprep.subr.mxu1 %v2814_v19 }
0x2112   :  { %v2658_v13 = vpop.eup %2657 }
0x2113   :  { %1495 = vrot.lane.b32.xlu1 %v2658_v13, %s2812_s1 }
0x2114   :  { %v2660_v23 = vpop.eup %2659 }
0x2115   :  { %v1489_v25 = vadd.f32 1.0, %v2660_v23 }
0x2117   :  { %2661 = vrcp.f32 %v1489_v25 }
0x2124   :  { %v2662_v26 = vpop.eup %2661 }
0x2125   :  { %v1493_v31 = vmul.f32 %v2662_v26, %v1372_v20 }
0x2185   :  { %v1496_v28 = vpop.permute.xlu1 %1495 }
0x2186   :  { %v1498_v29 = vmul.f32 %v2662_v26, %v1496_v28 }
0x2188   :  { %1500 = vrot.lane.b32.xlu1 %v1498_v29, %s2813_s3 }
0x21fa   :  { %v1501_v32 = vpop.permute.xlu1 %1500 }
0x21fb   :  { %v1503_v35 = vadd.f32 %v1501_v32, %v1493_v31 }
0x21fd   :  { %2663 = vtanh.f32 %v1503_v35 }
0x220a   :  { %v2664_v37 = vpop.eup %2663 }
0x220b   :  { %1506 = vrot.lane.b32.xlu0 %v2664_v37, %s2812_s1 }
0x220f   :  { %1529 = vperm.xlu0 %2554, %v3201_v34  }
0x2213   :  { %2555 = vset.pattern.permute.xlu0 %v2818_v6 }
0x227d   :  { %v1507_v43 = vpop.permute.xlu0 %1506 }
0x227e   :  { %v3292_v44 = vmul.f32 %v2662_v26, %v1507_v43 }
0x2280   :  { %1543 = vrot.lane.b32.xlu1 %v3292_v44, %s2813_s3 }
0x228a   :  { %v1530_v47 = vpop.permute.xlu0 %1529 }
0x228b   :  { %v1532_v48 = vmul.f32 %v3154_v22, %v1530_v47  ;;  %v1797_v47 = vstv %s1796_s25 }
0x228c   :  { %vm3348_vm6 = vcmp.eq.s32.totalorder %v1797_v47, 1 }
0x228d   :  { %v1533_v49 = vadd.f32 %v3160_v59, %v1532_v48 }
0x228f   :  { %v1541_v6 = vsel %vm3266_vm4, %v1533_v49, %v3217_v24  ;;  %v1802_v49 = vsel %vm3348_vm6, %v3130_v51, %v3165_v15 }
0x22f2   :  { %v1544_v46 = vpop.permute.xlu1 %1543 }
0x22f3   :  { %2474 = vmatmul.mubr.msk.f32.vlgmr.msra.gmra.mxu0 %vm174_vm1, %v1544_v46 }
0x22f4   :  { %2495 = vmatprep.mubr.msk.f32.mxu0 %vm2815_vm0, %v2814_v19  ;;  %2488 = vmatpush3.msra.mxu0 %v1802_v49 }
0x22f5   :  { %2489 = vmatprep.subr.mxu0 %v2814_v19 }
0x23b3   :  { %v1613_v50 = vpop.f32.mrf.mxu0 }
0x23b4   :  { %v1614_v3 = vadd.f32 %v1613_v50, %v1541_v6  ;;  %v1801_v6 = vsel %vm3348_vm6, %v3132_v52, %v3167_v16  ;;  %v1800_v50 = vsel %vm3348_vm6, %v3136_v53, %v3174_v27 }
0x23b5   :  { %v2475_v18 = vpop.f32.mrf.mxu0  ;;  %2490 = vmatpush3.msra.mxu0 %v1801_v6 }
0x23b6   :  { %2665 = vtanh.f32 %v1614_v3  ;;  %v2235_v20 = vmul.f32 -1.442695, %v1614_v3  ;;  %2491 = vmatprep.subr.mxu0 %v2814_v19  ;;  %v1799_v3 = vsel %vm3348_vm6, %v3140_v54, %v3184_v30 }
0x23b7   :  { %2492 = vmatpush3.msra.mxu0 %v1800_v50 }
0x23b8   :  { %2667 = vpow2.f32 %v2235_v20  ;;  %2493 = vmatprep.subr.mxu0 %v2814_v19 }
0x23b9   :  { %2494 = vmatpush3.msra.mxu0 %v1799_v3 }
0x23ba   :  { %2509 = vmatprep.subr.mxu0 %v2814_v19 }
0x23c3   :  { %v2666_v4 = vpop.eup %2665 }
0x23c4   :  { %1626 = vrot.lane.b32.xlu1 %v2666_v4, %s2812_s1 }
0x23c5   :  { %v2668_v56 = vpop.eup %2667 }
0x23c6   :  { %v1620_v21 = vadd.f32 1.0, %v2668_v56 }
0x23c8   :  { %2669 = vrcp.f32 %v1620_v21 }
0x23d5   :  { %v2670_v57 = vpop.eup %2669 }
0x23d6   :  { %v1624_v61 = vmul.f32 %v2670_v57, %v1503_v35 }
0x2436   :  { %v1627_v58 = vpop.permute.xlu1 %1626 }
0x2437   :  { %v1629_v60 = vmul.f32 %v2670_v57, %v1627_v58 }
0x2439   :  { %1631 = vrot.lane.b32.xlu1 %v1629_v60, %s2813_s3 }
0x24ab   :  { %v1632_v62 = vpop.permute.xlu1 %1631 }
0x24ac   :  { %v1634_v63 = vadd.f32 %v1632_v62, %v1624_v61 }
0x24ae   :  { %2671 = vtanh.f32 %v1634_v63 }
0x24bb   :  { %v2672_v5 = vpop.eup %2671 }
0x24bc   :  { %1637 = vrot.lane.b32.xlu0 %v2672_v5, %s2812_s1 }
0x24c0   :  { %1660 = vperm.xlu0 %2555, %v3201_v34  }
0x24c4   :  { %2556 = vset.pattern.permute.xlu0 %v2819_v33 }
0x252e   :  { %v1638_v12 = vpop.permute.xlu0 %1637 }
0x252f   :  { %v3333_v13 = vmul.f32 %v2670_v57, %v1638_v12 }
0x2531   :  { %1674 = vrot.lane.b32.xlu1 %v3333_v13, %s2813_s3 }
0x253b   :  { %v1661_v23 = vpop.permute.xlu0 %1660 }
0x253c   :  { %v1663_v25 = vmul.f32 %v3154_v22, %v1661_v23  ;;  %v1928_v23 = vstv %s1927_s27 }
0x253d   :  { %vm3389_vm7 = vcmp.eq.s32.totalorder %v1928_v23, 1 }
0x253e   :  { %v1664_v26 = vadd.f32 %v3160_v59, %v1663_v25 }
0x2540   :  { %v1672_v33 = vsel %vm3307_vm5, %v1664_v26, %v3217_v24  ;;  %v1933_v26 = vsel %vm3389_vm7, %v3130_v51, %v3165_v15 }
0x25a3   :  { %v1675_v14 = vpop.permute.xlu1 %1674 }
0x25a4   :  { %2485 = vmatmul.mubr.msk.f32.vlgmr.msra.gmra.mxu1 %vm174_vm1, %v1675_v14 }
0x25a5   :  { %2506 = vmatprep.mubr.msk.f32.mxu1 %vm2815_vm0, %v2814_v19  ;;  %2499 = vmatpush3.msra.mxu1 %v1933_v26 }
0x25a6   :  { %2500 = vmatprep.subr.mxu1 %v2814_v19 }
0x2664   :  { %v1744_v28 = vpop.f32.mrf.mxu1 }
0x2665   :  { %v1745_v29 = vadd.f32 %v1744_v28, %v1672_v33  ;;  %v1932_v33 = vsel %vm3389_vm7, %v3132_v52, %v3167_v16  ;;  %v1931_v28 = vsel %vm3389_vm7, %v3136_v53, %v3174_v27 }
0x2666   :  { %v2486_v31 = vpop.f32.mrf.mxu1  ;;  %2501 = vmatpush3.msra.mxu1 %v1932_v33 }
0x2667   :  { %2673 = vtanh.f32 %v1745_v29  ;;  %v2238_v35 = vmul.f32 -1.442695, %v1745_v29  ;;  %2502 = vmatprep.subr.mxu1 %v2814_v19  ;;  %v1930_v29 = vsel %vm3389_vm7, %v3140_v54, %v3184_v30 }
0x2668   :  { %2503 = vmatpush3.msra.mxu1 %v1931_v28 }
0x2669   :  { %2675 = vpow2.f32 %v2238_v35  ;;  %2504 = vmatprep.subr.mxu1 %v2814_v19 }
0x266a   :  { %2505 = vmatpush3.msra.mxu1 %v1930_v29 }
0x2674   :  { %v2674_v32 = vpop.eup %2673 }
0x2675   :  { %1757 = vrot.lane.b32.xlu1 %v2674_v32, %s2812_s1 }
0x2676   :  { %v2676_v37 = vpop.eup %2675 }
0x2677   :  { %v1751_v38 = vadd.f32 1.0, %v2676_v37 }
0x2679   :  { %2677 = vrcp.f32 %v1751_v38 }
0x2686   :  { %v2678_v39 = vpop.eup %2677 }
0x2687   :  { %v1755_v42 = vmul.f32 %v2678_v39, %v1634_v63 }
0x26e7   :  { %v1758_v40 = vpop.permute.xlu1 %1757 }
0x26e8   :  { %v1760_v41 = vmul.f32 %v2678_v39, %v1758_v40 }
0x26ea   :  { %1762 = vrot.lane.b32.xlu1 %v1760_v41, %s2813_s3 }
0x275c   :  { %v1763_v1 = vpop.permute.xlu1 %1762 }
0x275d   :  { %v1765_v43 = vadd.f32 %v1763_v1, %v1755_v42 }
0x275f   :  { %2679 = vtanh.f32 %v1765_v43 }
0x276c   :  { %v2680_v46 = vpop.eup %2679 }
0x276d   :  { %1768 = vrot.lane.b32.xlu0 %v2680_v46, %s2812_s1 }
0x2771   :  { %1791 = vperm.xlu0 %2556, %v3201_v34  }
0x2775   :  { %2557 = vset.pattern.permute.xlu0 %v2820_v55 }
0x27df   :  { %v1769_v18 = vpop.permute.xlu0 %1768 }
0x27e0   :  { %v3374_v4 = vmul.f32 %v2678_v39, %v1769_v18 }
0x27e2   :  { %1805 = vrot.lane.b32.xlu1 %v3374_v4, %s2813_s3 }
0x27ec   :  { %v1792_v56 = vpop.permute.xlu0 %1791 }
0x27ed   :  { %v1794_v21 = vmul.f32 %v3154_v22, %v1792_v56  ;;  %v2226_v56 = vld [vmem:[%s3501_s11] ss:$0 sm:$0xff]  ;;  %s2826_s11 = smov [#allocation11]  }
0x27ee   :  { %s2189_s9 = sshll.u32 %s2826_s11, 4  ;;  %s2190_s9 = int_to_ptr.vmem [resolvable:$true] %s2189_s9 }
0x27ef   :  { %v1795_v57 = vadd.f32 %v3160_v59, %v1794_v21  ;;  %v2059_v21 = vstv %s2058_s14  ;;  %s2777_s15 = scalar_lea.vmem %s2190_s9, 32  ;;  %p2782_p0 = scmp.lt.s32.totalorder %s2190_s9, %s2190_s9 }
0x27f0   :  { %vm3432_vm8 = vcmp.eq.s32.totalorder %v2059_v21, 1  ;;  %p2778_p13 = scmp.ne.s32.totalorder %s2190_s9, %s2777_s15  ;;  %p2783_p1 = scmp.lt.s32.totalorder %s2777_s15, %s2777_s15 }
0x27f1   :  { %v1803_v55 = vsel %vm3348_vm6, %v1795_v57, %v3217_v24 }
0x27f2   :  { %p2784_p2 = por %p2783_p1, %p2782_p0 }
0x27f4   :  { %p2785_p3 = pnand %p2784_p2, %p2778_p13 }
0x2854   :  { %v1806_v20 = vpop.permute.xlu1 %1805 }
0x2855   :  { %2496 = vmatmul.mubr.msk.f32.vlgmr.msra.gmra.mxu0 %vm174_vm1, %v1806_v20 }
0x2856   :  { %2517 = vmatprep.mubr.msk.f32.mxu0 %vm2815_vm0, %v2814_v19 }
0x2915   :  { %v1875_v58 = vpop.f32.mrf.mxu0 }
0x2916   :  { %v1876_v60 = vadd.f32 %v1875_v58, %v1803_v55  ;;  %v2063_v55 = vsel %vm3432_vm8, %v3132_v52, %v3167_v16 }
0x2917   :  { %v2497_v61 = vpop.f32.mrf.mxu0 }
0x2918   :  { %2681 = vtanh.f32 %v1876_v60  ;;  %v2241_v63 = vmul.f32 -1.442695, %v1876_v60 }
0x291a   :  { %2683 = vpow2.f32 %v2241_v63 }
0x2925   :  { %v2682_v62 = vpop.eup %2681 }
0x2926   :  { %1888 = vrot.lane.b32.xlu1 %v2682_v62, %s2812_s1 }
0x2927   :  { %v2684_v5 = vpop.eup %2683 }
0x2928   :  { %v1882_v7 = vadd.f32 1.0, %v2684_v5 }
0x292a   :  { %2685 = vrcp.f32 %v1882_v7 }
0x2937   :  { %v2686_v8 = vpop.eup %2685 }
0x2938   :  { %v1886_v10 = vmul.f32 %v2686_v8, %v1765_v43 }
0x2998   :  { %v1889_v9 = vpop.permute.xlu1 %1888 }
0x2999   :  { %v1891_v45 = vmul.f32 %v2686_v8, %v1889_v9 }
0x299b   :  { %1893 = vrot.lane.b32.xlu1 %v1891_v45, %s2813_s3 }
0x2a0d   :  { %v1894_v11 = vpop.permute.xlu1 %1893 }
0x2a0e   :  { %v1896_v12 = vadd.f32 %v1894_v11, %v1886_v10 }
0x2a10   :  { %2687 = vtanh.f32 %v1896_v12 }
0x2a1d   :  { %v2688_v14 = vpop.eup %2687 }
0x2a1e   :  { %1899 = vrot.lane.b32.xlu0 %v2688_v14, %s2812_s1 }
0x2a22   :  { %1922 = vperm.xlu0 %2557, %v3201_v34  }
0x2a26   :  { %2558 = vset.pattern.permute.xlu0 %v2821_v17 }
0x2a90   :  { %v1900_v31 = vpop.permute.xlu0 %1899 }
0x2a91   :  { %v3414_v32 = vmul.f32 %v2686_v8, %v1900_v31 }
0x2a93   :  { %1936 = vrot.lane.b32.xlu1 %v3414_v32, %s2813_s3 }
0x2a9d   :  { %v1923_v37 = vpop.permute.xlu0 %1922 }
0x2a9e   :  { %v1925_v38 = vmul.f32 %v3154_v22, %v1923_v37 }
0x2aa0   :  { %v1926_v39 = vadd.f32 %v3160_v59, %v1925_v38 }
0x2aa2   :  { %v1934_v40 = vsel %vm3389_vm7, %v1926_v39, %v3217_v24 }
0x2b05   :  { %v1937_v35 = vpop.permute.xlu1 %1936 }
0x2b06   :  { %2507 = vmatmul.mubr.msk.f32.vlgmr.msra.gmra.mxu1 %vm174_vm1, %v1937_v35 }
0x2bc6   :  { %v2006_v41 = vpop.f32.mrf.mxu1 }
0x2bc7   :  { %v2007_v17 = vadd.f32 %v2006_v41, %v1934_v40  ;;  %v2227_v41 = vld [vmem:[#allocation2] ss:$0 sm:$0xff] }
0x2bc8   :  { %v2508_v42 = vpop.f32.mrf.mxu1 }
0x2bc9   :  { %2689 = vtanh.f32 %v2007_v17  ;;  %v2244_v43 = vmul.f32 -1.442695, %v2007_v17 }
0x2bcb   :  { %2691 = vpow2.f32 %v2244_v43 }
0x2bd6   :  { %v2690_v1 = vpop.eup %2689 }
0x2bd7   :  { %2019 = vrot.lane.b32.xlu1 %v2690_v1, %s2812_s1 }
0x2bd8   :  { %v2692_v46 = vpop.eup %2691 }
0x2bd9   :  { %v2013_v47 = vadd.f32 1.0, %v2692_v46 }
0x2bdb   :  { %2693 = vrcp.f32 %v2013_v47 }
0x2be8   :  { %v2694_v48 = vpop.eup %2693 }
0x2be9   :  { %v2017_v50 = vmul.f32 %v2694_v48, %v1896_v12 }
0x2c49   :  { %v2020_v49 = vpop.permute.xlu1 %2019 }
0x2c4a   :  { %v2022_v6 = vmul.f32 %v2694_v48, %v2020_v49 }
0x2c4c   :  { %2024 = vrot.lane.b32.xlu1 %v2022_v6, %s2813_s3 }
0x2cbe   :  { %v2025_v3 = vpop.permute.xlu1 %2024 }
0x2cbf   :  { %v2027_v18 = vadd.f32 %v2025_v3, %v2017_v50 }
0x2cc1   :  { %2695 = vtanh.f32 %v2027_v18 }
0x2cce   :  { %v2696_v20 = vpop.eup %2695 }
0x2ccf   :  { %2030 = vrot.lane.b32.xlu0 %v2696_v20, %s2812_s1 }
0x2cd3   :  { %2053 = vperm.xlu0 %2558, %v3201_v34   ;;  %v2064_v34 = vsel %vm3432_vm8, %v3130_v51, %v3165_v15  ;;  %v2061_v51 = vsel %vm3432_vm8, %v3140_v54, %v3184_v30 }
0x2cd4   :  { %2510 = vmatpush3.msra.mxu0 %v2064_v34 }
0x2cd5   :  { %2511 = vmatprep.subr.mxu0 %v2814_v19 }
0x2cd6   :  { %2512 = vmatpush3.msra.mxu0 %v2063_v55 }
0x2cd7   :  { %1237 = vrot.lane.b32.xlu0 %v2226_v56, %s2825_s30  ;;  %2513 = vmatprep.subr.mxu0 %v2814_v19 }
0x2cd8   :  { %2560 = vset.pattern.permute.xlu0 %v2811_v2  ;;  %v2062_v2 = vsel %vm3432_vm8, %v3136_v53, %v3174_v27 }
0x2cd9   :  { %2514 = vmatpush3.msra.mxu0 %v2062_v2 }
0x2cda   :  { %2515 = vmatprep.subr.mxu0 %v2814_v19 }
0x2cdb   :  { %2516 = vmatpush3.msra.mxu0 %v2061_v51 }
0x2d41   :  { %v2031_v52 = vpop.permute.xlu0 %2030 }
0x2d42   :  { %v2033_v15 = vmul.f32 %v2694_v48, %v2031_v52 }
0x2d44   :  { %2067 = vrot.lane.b32.xlu1 %v2033_v15, %s2813_s3 }
0x2d4e   :  { %v2054_v53 = vpop.permute.xlu0 %2053 }
0x2d4f   :  { %v2056_v27 = vmul.f32 %v3154_v22, %v2054_v53 }
0x2d51   :  { %v2057_v58 = vadd.f32 %v3160_v59, %v2056_v27 }
0x2d52   :  { %v1238_v59 = vpop.permute.xlu0 %1237 }
0x2d53   :  { %v2065_v54 = vsel %vm3432_vm8, %v2057_v58, %v3217_v24  ;;  %v1240_v24 = vmul.f32 %v1238_v59, %v3205_v36  ;;  %v1379_v9 = vmul.f32 %v3251_v0, %v1238_v59  ;;  %v1641_v26 = vmul.f32 %v3333_v13, %v1238_v59 }
0x2d54   :  { %v1510_v0 = vmul.f32 %v3292_v44, %v1238_v59  ;;  %v1772_v33 = vmul.f32 %v3374_v4, %v1238_v59  ;;  %v1903_v28 = vmul.f32 %v3414_v32, %v1238_v59  ;;  %v2034_v29 = vmul.f32 %v2033_v15, %v1238_v59 }
0x2db6   :  { %v2068_v16 = vpop.permute.xlu1 %2067 }
0x2db7   :  { %2518 = vmatmul.mubr.msk.f32.vlgmr.msra.gmra.mxu0 %vm174_vm1, %v2068_v16  ;;  %v1131_v16 = vlaneseq }
0x2db9   :  { %v1132_v53 = vand.u32 127, %v1131_v16 }
0x2dbb   :  { %vm1256_vm10 = vcmp.eq.s32.totalorder %v1132_v53, 0  ;;  %vm1388_vm11 = vcmp.eq.s32.totalorder %v1132_v53, 1  ;;  %vm1519_vm12 = vcmp.eq.s32.totalorder %v1132_v53, 2  ;;  %vm1650_vm13 = vcmp.eq.s32.totalorder %v1132_v53, 3 }
0x2dbc   :  { %vm1781_vm14 = vcmp.eq.s32.totalorder %v1132_v53, 4  ;;  %vm1912_vm15 = vcmp.eq.s32.totalorder %v1132_v53, 5  ;;  %vm2043_vm0 = vcmp.eq.s32.totalorder %v1132_v53, 6  ;;  %vm2174_vm1 = vcmp.eq.s32.totalorder %v1132_v53, 7 }
0x2e77   :  { %v2137_v30 = vpop.f32.mrf.mxu0 }
0x2e78   :  { %v2138_v60 = vadd.f32 %v2137_v30, %v2065_v54 }
0x2e79   :  { %v2519_v19 = vpop.f32.mrf.mxu0 }
0x2e7a   :  { %2697 = vtanh.f32 %v2138_v60  ;;  %v2247_v62 = vmul.f32 -1.442695, %v2138_v60 }
0x2e7c   :  { %2699 = vpow2.f32 %v2247_v62 }
0x2e87   :  { %v2698_v61 = vpop.eup %2697 }
0x2e88   :  { %2150 = vrot.lane.b32.xlu1 %v2698_v61, %s2812_s1 }
0x2e89   :  { %v2700_v63 = vpop.eup %2699 }
0x2e8a   :  { %v2144_v5 = vadd.f32 1.0, %v2700_v63 }
0x2e8c   :  { %2701 = vrcp.f32 %v2144_v5 }
0x2e99   :  { %v2702_v7 = vpop.eup %2701 }
0x2e9a   :  { %v2148_v12 = vmul.f32 %v2702_v7, %v2027_v18 }
0x2efa   :  { %v2151_v22 = vpop.permute.xlu1 %2150 }
0x2efb   :  { %v2153_v8 = vmul.f32 %v2702_v7, %v2151_v22 }
0x2efd   :  { %2155 = vrot.lane.b32.xlu1 %v2153_v8, %s2813_s3 }
0x2f01   :  { %1242 = vrot.lane.b32.xlu1 %v1240_v24, %s2813_s3 }
0x2f05   :  { %1381 = vrot.lane.b32.xlu1 %v1379_v9, %s2813_s3 }
0x2f6f   :  { %v2156_v45 = vpop.permute.xlu1 %2155 }
0x2f70   :  { %v2158_v23 = vadd.f32 %v2156_v45, %v2148_v12 }
0x2f72   :  { %2703 = vtanh.f32 %v2158_v23 }
0x2f73   :  { %v1243_v10 = vpop.permute.xlu1 %1242 }
0x2f74   :  { %v1246_v11 = vsel %vm1245_vm9, %v1243_v10, 0.0 }
0x2f75   :  { %1247 = vadd.xlane.f32.xlu0 %v1246_v11 }
0x2f77   :  { %v1382_v14 = vpop.permute.xlu1 %1381 }
0x2f78   :  { %v1384_v25 = vsel %vm1245_vm9, %v1382_v14, 0.0 }
0x2f79   :  { %1385 = vadd.xlane.f32.xlu1 %v1384_v25 }
0x2f7f   :  { %v2704_v36 = vpop.eup %2703 }
0x2f8a   :  { %2161 = vrot.lane.b32.xlu1 %v2704_v36, %s2812_s1 }
0x2f8b   :  { %1643 = vrot.lane.b32.xlu0 %v1641_v26, %s2813_s3 }
0x2f8e   :  { %1512 = vrot.lane.b32.xlu1 %v1510_v0, %s2813_s3 }
0x2f8f   :  { %1774 = vrot.lane.b32.xlu0 %v1772_v33, %s2813_s3 }
0x2f93   :  { %1905 = vrot.lane.b32.xlu0 %v1903_v28, %s2813_s3 }
0x2f97   :  { %2036 = vrot.lane.b32.xlu0 %v2034_v29, %s2813_s3 }
0x2ffe   :  { %v1248_v13 = vpop.xlane.xlu0 %1247 }
0x2fff   :  { %v1255_v17 = vadd.f32 %v2227_v41, %v1248_v13 }
0x3002   :  { %v1386_v31 = vpop.xlane.xlu1 %1385  ;;  %v1644_v35 = vpop.permute.xlu0 %1643 }
0x3003   :  { %v1646_v1 = vsel %vm1245_vm9, %v1644_v35, 0.0  ;;  %v1387_v6 = vadd.f32 %v2227_v41, %v1386_v31 }
0x3006   :  { %v2162_v37 = vpop.permute.xlu1 %2161  ;;  %v1775_v40 = vpop.permute.xlu0 %1774 }
0x3007   :  { %v2164_v38 = vmul.f32 %v2702_v7, %v2162_v37  ;;  %v1777_v32 = vsel %vm1245_vm9, %v1775_v40, 0.0 }
0x3009   :  { %v2165_v39 = vmul.f32 %v2164_v38, %v1238_v59 }
0x300a   :  { %v1513_v44 = vpop.permute.xlu1 %1512  ;;  %v1906_v42 = vpop.permute.xlu0 %1905 }
0x300b   :  { %v1515_v4 = vsel %vm1245_vm9, %v1513_v44, 0.0  ;;  %2167 = vrot.lane.b32.xlu0 %v2165_v39, %s2813_s3  ;;  %v1908_v43 = vsel %vm1245_vm9, %v1906_v42, 0.0 }
0x300c   :  { %1516 = vadd.xlane.f32.xlu1 %v1515_v4 }
0x300e   :  { %v2037_v46 = vpop.permute.xlu0 %2036 }
0x300f   :  { %v2039_v47 = vsel %vm1245_vm9, %v2037_v46, 0.0 }
0x3010   :  { %1778 = vadd.xlane.f32.xlu1 %v1777_v32 }
0x3021   :  { %1259 = vperm.xlu1 %2559, %v1255_v17  }
0x302a   :  { %1647 = vadd.xlane.f32.xlu0 %v1646_v1 }
0x302e   :  { %1909 = vadd.xlane.f32.xlu0 %v1908_v43 }
0x3032   :  { %2040 = vadd.xlane.f32.xlu0 %v2039_v47 }
0x307d   :  { %v2168_v48 = vpop.permute.xlu0 %2167 }
0x307e   :  { %v2170_v49 = vsel %vm1245_vm9, %v2168_v48, 0.0 }
0x307f   :  { %2171 = vadd.xlane.f32.xlu0 %v2170_v49 }
0x3095   :  { %1391 = vperm.xlu0 %2560, %v1387_v6   ;;  %v1517_v50 = vpop.xlane.xlu1 %1516 }
0x3096   :  { %v1518_v3 = vadd.f32 %v2227_v41, %v1517_v50 }
0x3099   :  { %1522 = vperm.xlu0 %2560, %v1518_v3   ;;  %v1779_v18 = vpop.xlane.xlu1 %1778 }
0x309a   :  { %v1780_v20 = vadd.f32 %v2227_v41, %v1779_v18 }
0x309d   :  { %1784 = vperm.xlu0 %2560, %v1780_v20   ;;  %v1260_v27 = vpop.permute.xlu1 %1259 }
0x309e   :  { %v1262_v30 = vsel %vm1256_vm10, %v1260_v27, 0.0 }
0x30b3   :  { %v1648_v56 = vpop.xlane.xlu0 %1647 }
0x30b4   :  { %v1649_v21 = vadd.f32 %v2227_v41, %v1648_v56 }
0x30b6   :  { %1653 = vperm.xlu1 %2559, %v1649_v21  }
0x30b7   :  { %v1910_v57 = vpop.xlane.xlu0 %1909 }
0x30b8   :  { %v1911_v34 = vadd.f32 %v2227_v41, %v1910_v57 }
0x30ba   :  { %1915 = vperm.xlu1 %2559, %v1911_v34  }
0x30bb   :  { %v2041_v55 = vpop.xlane.xlu0 %2040 }
0x30bc   :  { %v2042_v2 = vadd.f32 %v2227_v41, %v2041_v55 }
0x30be   :  { %2046 = vperm.xlu0 %2560, %v2042_v2  }
0x3108   :  { %v2172_v51 = vpop.xlane.xlu0 %2171 }
0x3109   :  { %v2173_v52 = vadd.f32 %v2227_v41, %v2172_v51 }
0x310b   :  { %2177 = vperm.xlu0 %2560, %v2173_v52  }
0x3110   :  { %v1392_v15 = vpop.permute.xlu0 %1391 }
0x3111   :  { %v1394_v19 = vsel %vm1388_vm11, %v1392_v15, %v1262_v30 }
0x3114   :  { %v1523_v58 = vpop.permute.xlu0 %1522 }
0x3115   :  { %v1525_v61 = vsel %vm1519_vm12, %v1523_v58, %v1394_v19 }
0x3118   :  { %v1785_v60 = vpop.permute.xlu0 %1784 }
0x3131   :  { %v1654_v54 = vpop.permute.xlu1 %1653 }
0x3132   :  { %v1656_v62 = vsel %vm1650_vm13, %v1654_v54, %v1525_v61 }
0x3133   :  { %v1787_v7 = vsel %vm1781_vm14, %v1785_v60, %v1656_v62 }
0x3135   :  { %v1916_v63 = vpop.permute.xlu1 %1915 }
0x3136   :  { %v1918_v22 = vsel %vm1912_vm15, %v1916_v63, %v1787_v7 }
0x3139   :  { %v2047_v5 = vpop.permute.xlu0 %2046 }
0x313a   :  { %v2049_v8 = vsel %vm2043_vm0, %v2047_v5, %v1918_v22 }
0x3186   :  { %v2178_v59 = vpop.permute.xlu0 %2177 }
0x3187   :  { %v2180_v24 = vsel %vm2174_vm1, %v2178_v59, %v2049_v8 }
0x3188   :  { %2182 = vst.msk [vmem:[#allocation11] sm:$0x3] %vm2181_vm2, %v2180_v24 }
0x3189   :  { %2788 = shalt.err (!%p2785_p3)
}
0x318a   :  { %2192 = dma.vmem_to_hbm [thread:$0]  %s2190_s9, 32, %s3503_s13, [#allocation5]  }
0x318b   :  { %2803 = dma.done.wait [#allocation5], 32  }
0x318c   :  { %2804 = vsyncadd [#allocation5], 4294967264 }
0x318d   :  { %2196 = vsyncpa [#allocation4], 1 }
0x318e   :  { %2197 = vsyncpa [#allocation9], 1 }
0x318f   :  { %2198 = vsyncpa [#allocation5], 1 }
0x3190   :  { %2199 = vsyncpa [#allocation6], 1 }

</bundles_post_ra>
